<compile_context>
chip_gen: v5e
topology: v5e:2x2
jax: 0.10.0
libtpu: 0.0.40
codegen_flags: <defaults>
</compile_context>

<pallas_src>
import jax
import jax.numpy as jnp
import numpy as np
from jax.experimental import pallas as pl
from jax.experimental.pallas import tpu as pltpu


# ------------------------------ fused kernel -------------------------------

def _fused_kernel(xp_ref, knn_ref,
                  wt_ref, bt_ref,
                  w1a_ref, w1b_ref, b1_ref,
                  w2a_ref, w2x_ref, b2_ref,
                  w3h_ref, w3x_ref, b3_ref,
                  w4h_ref, w4x_ref, b4_ref,
                  aw_ref, ab_ref,
                  y_ref, att_ref, grad_ref):
    # xp_ref : (1, 6, TN)      packed [x(3); pos(3)] center points
    # knn_ref: (1, K, 6, TN)   packed gathered neighbors
    # y_ref  : (1, 60, TN); att_ref/grad_ref: (1, K, TN)
    K = knn_ref.shape[1]
    TN = xp_ref.shape[-1]

    def mm(a, b):
        return jnp.dot(a, b, preferred_element_type=jnp.float32)

    def fma3(w, v):
        # 3-deep contraction on the VPU: w (C,3), v (3,W) -> (C,W).
        # Avoids an MXU fill/drain for a <=3/256-utilization dot.
        return w[:, 0:1] * v[0:1] + w[:, 1:2] * v[1:2] + w[:, 2:3] * v[2:3]

    x_raw = xp_ref[0, 0:3, :]                       # (3, TN)
    pos = xp_ref[0, 3:6, :]                         # (3, TN)

    wt = wt_ref[...]; bt = bt_ref[...]
    w1a = w1a_ref[...]; w1b = w1b_ref[...]; b1 = b1_ref[...]
    w2a = w2a_ref[...]; w2x = w2x_ref[...]; b2 = b2_ref[...]
    w3h = w3h_ref[...]; w3x = w3x_ref[...]; b3 = b3_ref[...]
    w4h = w4h_ref[...]; w4x = w4x_ref[...]; b4 = b4_ref[...]

    # ---- k-invariant work (computed once per grid step) ----
    xf = jnp.maximum(fma3(wt, x_raw) + bt, 0.0)     # (24, TN) trans(x)+BN+ReLU
    cx2 = mm(w2x, xf)                               # (16, TN) x-part of conv2
    cx3 = mm(w3x, xf)                               # (16, TN) x-part of conv3
    cx4 = mm(w4x, xf)                               # (60, TN) x-part of conv_out

    # ---- fold K into the lane axis: working width W = K * TN ----
    kxyz = jnp.concatenate([knn_ref[0, k, 0:3, :] for k in range(K)], axis=-1)
    kpos = jnp.concatenate([knn_ref[0, k, 3:6, :] for k in range(K)], axis=-1)
    pn = kpos - jnp.concatenate([pos] * K, axis=-1)           # (3, W) rel. pos

    # GAM gradient / distance / attention, vectorized across K
    p0, p1, p2 = pn[0:1], pn[1:2], pn[2:3]
    dist = jnp.maximum(jnp.sqrt(p0 * p0 + p1 * p1 + p2 * p2), 1e-16)
    xy = jnp.maximum(jnp.sqrt(p0 * p0 + p1 * p1), 1e-16)
    grad = (p2 / dist) * (p0 + p1) / xy                        # (1, W)
    logit = grad * aw_ref[0, 0] + dist * aw_ref[0, 1] + ab_ref[0, 0]
    att = 1.0 / (1.0 + jnp.exp(-logit))                        # sigmoid

    # one dense (K, TN) store per grid step (no 1-sublane masked stores)
    att_ref[0] = jnp.concatenate(
        [att[:, k * TN:(k + 1) * TN] for k in range(K)], axis=0)
    grad_ref[0] = jnp.concatenate(
        [grad[:, k * TN:(k + 1) * TN] for k in range(K)], axis=0)

    # neighbor features: trans conv is pointwise, so conv-after-gather equals
    # gather-after-conv; then attention modulation + relative edge feature.
    kf = jnp.maximum(fma3(wt, kxyz) + bt, 0.0)                 # (24, W)
    xf_t = jnp.concatenate([xf] * K, axis=-1)                  # (24, W)
    ex = kf * (att + 1.0) - xf_t                               # knn_mod - x_tiled

    # dense block, single pass at width W (growth rows padded 12->16)
    cx2_t = jnp.concatenate([cx2] * K, axis=-1)
    cx3_t = jnp.concatenate([cx3] * K, axis=-1)
    cx4_t = jnp.concatenate([cx4] * K, axis=-1)
    h1 = jnp.maximum(fma3(w1a, pn) + mm(w1b, ex) + b1, 0.0)               # (16, W)
    h2 = jnp.maximum(mm(w2a, h1) + cx2_t + b2, 0.0)                       # (16, W)
    h3 = jnp.maximum(mm(w3h, jnp.concatenate([h2, h1], axis=0))
                     + cx3_t + b3, 0.0)                                   # (16, W)
    out = mm(w4h, jnp.concatenate([h3, h2, h1], axis=0)) + cx4_t + b4     # (60, W)

    # max aggregation over the K lane blocks
    res = out[:, 0:TN]
    for k in range(1, K):
        res = jnp.maximum(res, out[:, k * TN:(k + 1) * TN])
    y_ref[0] = res


# ------------------------------ host wrapper --------------------------------

def _pick_tile_n(N, B, cap=2048):
    if N <= 128:
        return N
    tile = min(cap, 128 * ((N + 127) // 128))
    if B == 1:
        # keep >= 2 N-tiles so both v7x TensorCores get parallel work
        while tile > 128 and (N + tile - 1) // tile < 2:
            tile -= 128
    return tile


def graph_conv2_fused(xp, knn, kp, tile_n=None):
    """xp: (B, 6, N) packed [x; pos]; knn: (B, K, 6, N) packed gathered nbrs."""
    B, _, N = xp.shape
    K = knn.shape[1]
    if tile_n is None:
        tile_n = _pick_tile_n(N, B)
    nt = (N + tile_n - 1) // tile_n
    Np = nt * tile_n
    if Np != N:                                   # pad N to a tile multiple
        xp = jnp.pad(xp, ((0, 0), (0, 0), (0, Np - N)))
        knn = jnp.pad(knn, ((0, 0), (0, 0), (0, 0), (0, Np - N)))

    names = ("wt", "bt", "w1a", "w1b", "b1", "w2a", "w2x", "b2",
             "w3h", "w3x", "b3", "w4h", "w4x", "b4")
    weights = [kp[n] for n in names]
    aw, ab = kp["aw"], kp["ab"]
    dout = kp["w4h"].shape[0]

    def wspec(a):
        nd = a.ndim
        return pl.BlockSpec(a.shape, lambda b, t, _nd=nd: (0,) * _nd)

    def sspec(a):
        nd = a.ndim
        return pl.BlockSpec(a.shape, lambda b, t, _nd=nd: (0,) * _nd,
                            memory_space=pltpu.MemorySpace.SMEM)

    y, att, grad = pl.pallas_call(
        _fused_kernel,
        out_shape=(
            jax.ShapeDtypeStruct((B, dout, Np), jnp.float32),
            jax.ShapeDtypeStruct((B, K, Np), jnp.float32),
            jax.ShapeDtypeStruct((B, K, Np), jnp.float32),
        ),
        grid=(B, nt),
        in_specs=[
            pl.BlockSpec((1, 6, tile_n), lambda b, t: (b, 0, t)),
            pl.BlockSpec((1, K, 6, tile_n), lambda b, t: (b, 0, 0, t)),
        ] + [wspec(w) for w in weights] + [sspec(aw), sspec(ab)],
        out_specs=(
            pl.BlockSpec((1, dout, tile_n), lambda b, t: (b, 0, t)),
            pl.BlockSpec((1, K, tile_n), lambda b, t: (b, 0, t)),
            pl.BlockSpec((1, K, tile_n), lambda b, t: (b, 0, t)),
        ),
        compiler_params=pltpu.CompilerParams(
            dimension_semantics=("parallel", "parallel"),
            vmem_limit_bytes=40 * 1024 * 1024),
    )(xp, knn, *weights, aw, ab)

    if Np != N:
        y, att, grad = y[..., :N], att[..., :N], grad[..., :N]
    return y, att, grad


def prep_params(params):
    """Host-side weight slicing + growth-rate padding (12 -> 16 rows/cols):
    the kernel never slices weights at unaligned offsets, the h-slab concats
    are 8-sublane aligned, and conv3/conv_out collapse to single deep dots."""
    wt, bt = params["trans"]
    w1, b1 = params["layer_first"]
    w2, b2 = params["layer_mid0"]
    w3, b3 = params["layer_last"]
    w4, b4 = params["layer_out"]
    G = w1.shape[0]
    GP = ((G + 7) // 8) * 8

    def padr(a):
        return jnp.pad(a, ((0, GP - a.shape[0]), (0, 0)))

    def padc(a):
        return jnp.pad(a, ((0, 0), (0, GP - a.shape[1])))

    return {
        "wt": wt, "bt": bt,
        "w1a": padr(w1[:, 0:3]), "w1b": padr(w1[:, 3:]), "b1": padr(b1),
        "w2a": padc(padr(w2[:, 0:G])), "w2x": padr(w2[:, G:]), "b2": padr(b2),
        "w3h": jnp.concatenate([padc(padr(w3[:, 0:G])),
                                padc(padr(w3[:, G:2 * G]))], axis=1),
        "w3x": padr(w3[:, 2 * G:]), "b3": padr(b3),
        "w4h": jnp.concatenate([padc(w4[:, 0:G]), padc(w4[:, G:2 * G]),
                                padc(w4[:, 2 * G:3 * G])], axis=1),
        "w4x": w4[:, 3 * G:], "b4": b4,
        "aw": params["act_w"], "ab": params["act_b"],
    }


def encode_forward(x, pos, knn_idx, params, tile_n=None):
    """x: (B, 3, N), pos: (B, 3, N), knn_idx: (B, N, K) int32."""
    kp = prep_params(params)
    # Pack x+pos into one 6-channel tensor and gather ONCE, directly into the
    # (B, K, 6, N) layout the kernel wants (N stays minor -> no minor-dim
    # transpose after the gather).
    # TODO(synk): an in-kernel DMA gather driven by scalar-prefetched knn_idx
    # would remove this XLA gather entirely; not implemented here.
    xp6 = jnp.concatenate([x, pos], axis=1)                           # (B, 6, N)
    idx_t = jnp.swapaxes(knn_idx, 1, 2)                               # (B, K, N)
    knn6 = jax.vmap(lambda m, it: jax.vmap(lambda r: m[:, r])(it))(xp6, idx_t)

    y, att, grad = graph_conv2_fused(xp6, knn6, kp, tile_n=tile_n)
    aa = jnp.swapaxes(att, 1, 2)[:, None]                             # (B,1,N,K)
    gg = jnp.swapaxes(grad, 1, 2)[:, None]                            # (B,1,N,K)
    knn_pos_nck = jnp.transpose(knn6[:, :, 3:6, :], (0, 2, 3, 1))     # (B,3,N,K)
    return y, [aa], [gg], [knn_pos_nck]


# ------------------------------- glue / params -----------------------------

def knn_group(t, idx):
    # knn_group_v2: t (B, C, N), idx (B, N, K) -> out[b,c,n,k] = t[b,c,idx[b,n,k]]
    return jax.vmap(lambda tb, ib: tb[:, ib])(t, idx)


def make_params(key, conv_channels=24, growth_rate=12):
    keys = jax.random.split(key, 7)

    def conv1d(k, cin, cout, with_bn=True):
        k1, k2, k3, k4 = jax.random.split(k, 4)
        w = jax.random.normal(k1, (cout, cin), jnp.float32) / jnp.sqrt(cin)
        b = 0.1 * jax.random.normal(k2, (cout,), jnp.float32)
        if with_bn:
            # eval-mode BatchNorm1d folded into the conv weight/bias
            gamma = 1.0 + 0.1 * jax.random.normal(k3, (cout,), jnp.float32)
            beta = 0.1 * jax.random.normal(k4, (cout,), jnp.float32)
            rmean = jnp.zeros((cout,), jnp.float32)
            rvar = jnp.ones((cout,), jnp.float32)
            scale = gamma / jnp.sqrt(rvar + 1e-5)
            w = w * scale[:, None]
            b = scale * (b - rmean) + beta
        return w.astype(jnp.float32), b.reshape(cout, 1).astype(jnp.float32)

    C, G = conv_channels, growth_rate
    return {
        "trans": conv1d(keys[0], 3, C, True),              # Conv1D(3, 24)
        "layer_first": conv1d(keys[1], C + 3, G, True),    # relative_feat_only
        "layer_mid0": conv1d(keys[2], C + G, G, True),
        "layer_last": conv1d(keys[3], C + 2 * G, G, True),
        "layer_out": conv1d(keys[4], C + 3 * G, C + 3 * G, False),
        "act_w": 0.5 * jax.random.normal(keys[5], (1, 2), jnp.float32),
        "act_b": 0.1 * jax.random.normal(keys[6], (1, 1), jnp.float32),
    }


# --------------------------- pure-JAX reference -----------------------------

def encode_ref(x, pos, knn_idx, params):
    B, _, N = x.shape
    K = knn_idx.shape[-1]

    def conv(wb, inp, relu=True):
        w, b = wb
        y = jnp.einsum("oc,bcl->bol", w, inp, precision="highest") + b[None]
        return jnp.maximum(y, 0.0) if relu else y

    xf = conv(params["trans"], x)                          # (B, 24, N)
    D = xf.shape[1]
    knn_feat = knn_group(xf, knn_idx)                      # (B, D, N, K)
    knn_pos = knn_group(pos, knn_idx)                      # (B, 3, N, K)
    pos_norm = knn_pos - pos[..., None]                    # (B, 3, N, K)
    dist = jnp.maximum(jnp.sqrt((pos_norm ** 2).sum(1, keepdims=True)), 1e-16)
    xy = jnp.maximum(jnp.sqrt((pos_norm[:, :2] ** 2).sum(1, keepdims=True)), 1e-16)
    grad = pos_norm[:, 2:3] / dist * (pos_norm[:, 0:1] + pos_norm[:, 1:2]) / xy
    aw, ab = params["act_w"], params["act_b"]
    att = 1.0 / (1.0 + jnp.exp(-(grad * aw[0, 0] + dist * aw[0, 1] + ab[0, 0])))
    knn_mod = knn_feat * att + knn_feat
    edge = jnp.concatenate([pos_norm, knn_mod - xf[..., None]], axis=1)
    edge = edge.reshape(B, -1, N * K)
    x_rep = jnp.repeat(xf[..., None], K, axis=-1).reshape(B, D, N * K)
    y = jnp.concatenate([conv(params["layer_first"], edge), x_rep], axis=1)
    y = jnp.concatenate([conv(params["layer_mid0"], y), y], axis=1)
    y = jnp.concatenate([conv(params["layer_last"], y), y], axis=1)
    y = conv(params["layer_out"], y, relu=False)
    y = y.reshape(B, -1, N, K).max(axis=-1)
    return y, att, grad, knn_pos


# ---------------------------------- main ------------------------------------

if __name__ == "__main__":
    key = jax.random.PRNGKey(0)
    kx, kpos_key, ki, kw = jax.random.split(key, 4)
    B, N, K = 2, 16, 4                       # knn=4, small demo shapes
    x = jax.random.normal(kx, (B, 3, N), jnp.float32)
    pos = jax.random.normal(kpos_key, (B, 3, N), jnp.float32)
    knn_idx = jax.random.randint(ki, (B, N, K), 0, N, jnp.int32)
    params = make_params(kw)

    fwd = jax.jit(encode_forward)
    y, aa, gg, kpos = fwd(x, pos, knn_idx, params)
    jax.block_until_ready(y)

    y_ref, att_ref, grad_ref, kpos_ref = encode_ref(x, pos, knn_idx, params)
    np.testing.assert_allclose(np.asarray(y), np.asarray(y_ref), rtol=2e-3, atol=2e-3)
    np.testing.assert_allclose(np.asarray(aa[0]), np.asarray(att_ref), rtol=1e-3, atol=1e-3)
    np.testing.assert_allclose(np.asarray(gg[0]), np.asarray(grad_ref), rtol=1e-3, atol=1e-3)
    np.testing.assert_allclose(np.asarray(kpos[0]), np.asarray(kpos_ref), rtol=1e-3, atol=1e-3)

    # also exercise the tiled multi-grid-step path (B=1 -> >=2 N-tiles)
    k2x, k2p, k2i = jax.random.split(jax.random.PRNGKey(1), 3)
    B2, N2 = 1, 256
    x2 = jax.random.normal(k2x, (B2, 3, N2), jnp.float32)
    pos2 = jax.random.normal(k2p, (B2, 3, N2), jnp.float32)
    idx2 = jax.random.randint(k2i, (B2, N2, K), 0, N2, jnp.int32)
    y2, aa2, gg2, _ = jax.jit(encode_forward)(x2, pos2, idx2, params)
    jax.block_until_ready(y2)
    y2_ref, att2_ref, grad2_ref, _ = encode_ref(x2, pos2, idx2, params)
    np.testing.assert_allclose(np.asarray(y2), np.asarray(y2_ref), rtol=2e-3, atol=2e-3)
    np.testing.assert_allclose(np.asarray(aa2[0]), np.asarray(att2_ref), rtol=1e-3, atol=1e-3)
    np.testing.assert_allclose(np.asarray(gg2[0]), np.asarray(grad2_ref), rtol=1e-3, atol=1e-3)

    print("KERNEL_OK")
</pallas_src>

<mosaic_0001>
module attributes {stable_mosaic.version = 11 : i64} {
  func.func @_fused_kernel(%arg0: i32, %arg1: i32, %arg2: memref<1x6x16xf32, #tpu.memory_space<vmem>>, %arg3: memref<1x4x6x16xf32, #tpu.memory_space<vmem>>, %arg4: memref<24x3xf32, #tpu.memory_space<vmem>>, %arg5: memref<24x1xf32, #tpu.memory_space<vmem>>, %arg6: memref<16x3xf32, #tpu.memory_space<vmem>>, %arg7: memref<16x24xf32, #tpu.memory_space<vmem>>, %arg8: memref<16x1xf32, #tpu.memory_space<vmem>>, %arg9: memref<16x16xf32, #tpu.memory_space<vmem>>, %arg10: memref<16x24xf32, #tpu.memory_space<vmem>>, %arg11: memref<16x1xf32, #tpu.memory_space<vmem>>, %arg12: memref<16x32xf32, #tpu.memory_space<vmem>>, %arg13: memref<16x24xf32, #tpu.memory_space<vmem>>, %arg14: memref<16x1xf32, #tpu.memory_space<vmem>>, %arg15: memref<60x48xf32, #tpu.memory_space<vmem>>, %arg16: memref<60x24xf32, #tpu.memory_space<vmem>>, %arg17: memref<60x1xf32, #tpu.memory_space<vmem>>, %arg18: memref<1x2xf32, #tpu.memory_space<smem>>, %arg19: memref<1x1xf32, #tpu.memory_space<smem>>, %arg20: memref<1x60x16xf32, #tpu.memory_space<vmem>>, %arg21: memref<1x4x16xf32, #tpu.memory_space<vmem>>, %arg22: memref<1x4x16xf32, #tpu.memory_space<vmem>>) attributes {dimension_semantics = [#tpu.dimension_semantics<parallel>, #tpu.dimension_semantics<parallel>], iteration_bounds = array<i64: 2, 1>, scalar_prefetch = 0 : i64, scratch_operands = 0 : i64, tpu.core_type = #tpu.core_type<tc>, window_params = [{transform_indices = @transform_0, window_bounds = array<i64: 1, 6, 16>}, {transform_indices = @transform_1, window_bounds = array<i64: 1, 4, 6, 16>}, {pipeline_mode = #tpu.pipeline_mode<synchronous>, transform_indices = @transform_2, window_bounds = array<i64: 24, 3>}, {pipeline_mode = #tpu.pipeline_mode<synchronous>, transform_indices = @transform_3, window_bounds = array<i64: 24, 1>}, {pipeline_mode = #tpu.pipeline_mode<synchronous>, transform_indices = @transform_4, window_bounds = array<i64: 16, 3>}, {pipeline_mode = #tpu.pipeline_mode<synchronous>, transform_indices = @transform_5, window_bounds = array<i64: 16, 24>}, {pipeline_mode = #tpu.pipeline_mode<synchronous>, transform_indices = @transform_6, window_bounds = array<i64: 16, 1>}, {pipeline_mode = #tpu.pipeline_mode<synchronous>, transform_indices = @transform_7, window_bounds = array<i64: 16, 16>}, {pipeline_mode = #tpu.pipeline_mode<synchronous>, transform_indices = @transform_8, window_bounds = array<i64: 16, 24>}, {pipeline_mode = #tpu.pipeline_mode<synchronous>, transform_indices = @transform_9, window_bounds = array<i64: 16, 1>}, {pipeline_mode = #tpu.pipeline_mode<synchronous>, transform_indices = @transform_10, window_bounds = array<i64: 16, 32>}, {pipeline_mode = #tpu.pipeline_mode<synchronous>, transform_indices = @transform_11, window_bounds = array<i64: 16, 24>}, {pipeline_mode = #tpu.pipeline_mode<synchronous>, transform_indices = @transform_12, window_bounds = array<i64: 16, 1>}, {pipeline_mode = #tpu.pipeline_mode<synchronous>, transform_indices = @transform_13, window_bounds = array<i64: 60, 48>}, {pipeline_mode = #tpu.pipeline_mode<synchronous>, transform_indices = @transform_14, window_bounds = array<i64: 60, 24>}, {pipeline_mode = #tpu.pipeline_mode<synchronous>, transform_indices = @transform_15, window_bounds = array<i64: 60, 1>}, {transform_indices = @transform_16, window_bounds = array<i64: 1, 2>}, {transform_indices = @transform_17, window_bounds = array<i64: 1, 1>}, {transform_indices = @transform_18, window_bounds = array<i64: 1, 60, 16>}, {transform_indices = @transform_19, window_bounds = array<i64: 1, 4, 16>}, {transform_indices = @transform_20, window_bounds = array<i64: 1, 4, 16>}]} {
    %c0 = arith.constant 0 : index
    %c0_0 = arith.constant 0 : index
    %c0_1 = arith.constant 0 : index
    %0 = vector.load %arg2[%c0, %c0_0, %c0_1] : memref<1x6x16xf32, #tpu.memory_space<vmem>>, vector<1x3x16xf32>
    %1 = vector.shape_cast %0 : vector<1x3x16xf32> to vector<3x16xf32>
    %c0_2 = arith.constant 0 : index
    %c3 = arith.constant 3 : index
    %c0_3 = arith.constant 0 : index
    %2 = vector.load %arg2[%c0_2, %c3, %c0_3] : memref<1x6x16xf32, #tpu.memory_space<vmem>>, vector<1x3x16xf32>
    %3 = vector.shape_cast %2 : vector<1x3x16xf32> to vector<3x16xf32>
    %c0_4 = arith.constant 0 : index
    %c0_5 = arith.constant 0 : index
    %4 = vector.load %arg4[%c0_4, %c0_5] : memref<24x3xf32, #tpu.memory_space<vmem>>, vector<24x3xf32>
    %c0_6 = arith.constant 0 : index
    %c0_7 = arith.constant 0 : index
    %5 = vector.load %arg5[%c0_6, %c0_7] : memref<24x1xf32, #tpu.memory_space<vmem>>, vector<24x1xf32>
    %c0_8 = arith.constant 0 : index
    %c0_9 = arith.constant 0 : index
    %6 = vector.load %arg6[%c0_8, %c0_9] : memref<16x3xf32, #tpu.memory_space<vmem>>, vector<16x3xf32>
    %c0_10 = arith.constant 0 : index
    %c0_11 = arith.constant 0 : index
    %7 = vector.load %arg7[%c0_10, %c0_11] : memref<16x24xf32, #tpu.memory_space<vmem>>, vector<16x24xf32>
    %c0_12 = arith.constant 0 : index
    %c0_13 = arith.constant 0 : index
    %8 = vector.load %arg8[%c0_12, %c0_13] : memref<16x1xf32, #tpu.memory_space<vmem>>, vector<16x1xf32>
    %c0_14 = arith.constant 0 : index
    %c0_15 = arith.constant 0 : index
    %9 = vector.load %arg9[%c0_14, %c0_15] : memref<16x16xf32, #tpu.memory_space<vmem>>, vector<16x16xf32>
    %c0_16 = arith.constant 0 : index
    %c0_17 = arith.constant 0 : index
    %10 = vector.load %arg10[%c0_16, %c0_17] : memref<16x24xf32, #tpu.memory_space<vmem>>, vector<16x24xf32>
    %c0_18 = arith.constant 0 : index
    %c0_19 = arith.constant 0 : index
    %11 = vector.load %arg11[%c0_18, %c0_19] : memref<16x1xf32, #tpu.memory_space<vmem>>, vector<16x1xf32>
    %c0_20 = arith.constant 0 : index
    %c0_21 = arith.constant 0 : index
    %12 = vector.load %arg12[%c0_20, %c0_21] : memref<16x32xf32, #tpu.memory_space<vmem>>, vector<16x32xf32>
    %c0_22 = arith.constant 0 : index
    %c0_23 = arith.constant 0 : index
    %13 = vector.load %arg13[%c0_22, %c0_23] : memref<16x24xf32, #tpu.memory_space<vmem>>, vector<16x24xf32>
    %c0_24 = arith.constant 0 : index
    %c0_25 = arith.constant 0 : index
    %14 = vector.load %arg14[%c0_24, %c0_25] : memref<16x1xf32, #tpu.memory_space<vmem>>, vector<16x1xf32>
    %c0_26 = arith.constant 0 : index
    %c0_27 = arith.constant 0 : index
    %15 = vector.load %arg15[%c0_26, %c0_27] : memref<60x48xf32, #tpu.memory_space<vmem>>, vector<60x48xf32>
    %c0_28 = arith.constant 0 : index
    %c0_29 = arith.constant 0 : index
    %16 = vector.load %arg16[%c0_28, %c0_29] : memref<60x24xf32, #tpu.memory_space<vmem>>, vector<60x24xf32>
    %c0_30 = arith.constant 0 : index
    %c0_31 = arith.constant 0 : index
    %17 = vector.load %arg17[%c0_30, %c0_31] : memref<60x1xf32, #tpu.memory_space<vmem>>, vector<60x1xf32>
    %18 = vector.extract_strided_slice %4 {offsets = [0, 0], sizes = [24, 1], strides = [1, 1]} : vector<24x3xf32> to vector<24x1xf32>
    %19 = vector.extract_strided_slice %1 {offsets = [0, 0], sizes = [1, 16], strides = [1, 1]} : vector<3x16xf32> to vector<1x16xf32>
    %20 = vector.broadcast %18 : vector<24x1xf32> to vector<24x16xf32>
    %21 = vector.broadcast %19 : vector<1x16xf32> to vector<24x16xf32>
    %22 = arith.mulf %20, %21 : vector<24x16xf32>
    %23 = vector.extract_strided_slice %4 {offsets = [0, 1], sizes = [24, 1], strides = [1, 1]} : vector<24x3xf32> to vector<24x1xf32>
    %24 = vector.extract_strided_slice %1 {offsets = [1, 0], sizes = [1, 16], strides = [1, 1]} : vector<3x16xf32> to vector<1x16xf32>
    %25 = vector.broadcast %23 : vector<24x1xf32> to vector<24x16xf32>
    %26 = vector.broadcast %24 : vector<1x16xf32> to vector<24x16xf32>
    %27 = arith.mulf %25, %26 : vector<24x16xf32>
    %28 = arith.addf %22, %27 : vector<24x16xf32>
    %29 = vector.extract_strided_slice %4 {offsets = [0, 2], sizes = [24, 1], strides = [1, 1]} : vector<24x3xf32> to vector<24x1xf32>
    %30 = vector.extract_strided_slice %1 {offsets = [2, 0], sizes = [1, 16], strides = [1, 1]} : vector<3x16xf32> to vector<1x16xf32>
    %31 = vector.broadcast %29 : vector<24x1xf32> to vector<24x16xf32>
    %32 = vector.broadcast %30 : vector<1x16xf32> to vector<24x16xf32>
    %33 = arith.mulf %31, %32 : vector<24x16xf32>
    %34 = arith.addf %28, %33 : vector<24x16xf32>
    %35 = vector.broadcast %5 : vector<24x1xf32> to vector<24x16xf32>
    %36 = arith.addf %34, %35 : vector<24x16xf32>
    %cst = arith.constant 0.000000e+00 : f32
    %37 = vector.broadcast %cst : f32 to vector<24x16xf32>
    %38 = arith.maximumf %36, %37 : vector<24x16xf32>
    %cst_32 = arith.constant dense<0.000000e+00> : vector<16x16xf32>
    %39 = tpu.matmul %10, %38, %cst_32 {dimension_numbers = #tpu.dot_dimension_numbers<[1], [0], [0], [1], [0, 0, 1, 1], [], []>} : vector<16x24xf32>, vector<24x16xf32>, vector<16x16xf32> -> vector<16x16xf32>
    %cst_33 = arith.constant dense<0.000000e+00> : vector<16x16xf32>
    %40 = tpu.matmul %13, %38, %cst_33 {dimension_numbers = #tpu.dot_dimension_numbers<[1], [0], [0], [1], [0, 0, 1, 1], [], []>} : vector<16x24xf32>, vector<24x16xf32>, vector<16x16xf32> -> vector<16x16xf32>
    %cst_34 = arith.constant dense<0.000000e+00> : vector<60x16xf32>
    %41 = tpu.matmul %16, %38, %cst_34 {dimension_numbers = #tpu.dot_dimension_numbers<[1], [0], [0], [1], [0, 0, 1, 1], [], []>} : vector<60x24xf32>, vector<24x16xf32>, vector<60x16xf32> -> vector<60x16xf32>
    %c0_35 = arith.constant 0 : index
    %c0_36 = arith.constant 0 : index
    %c0_37 = arith.constant 0 : index
    %c0_38 = arith.constant 0 : index
    %42 = vector.load %arg3[%c0_35, %c0_36, %c0_37, %c0_38] : memref<1x4x6x16xf32, #tpu.memory_space<vmem>>, vector<1x1x3x16xf32>
    %43 = vector.shape_cast %42 : vector<1x1x3x16xf32> to vector<3x16xf32>
    %c0_39 = arith.constant 0 : index
    %c1 = arith.constant 1 : index
    %c0_40 = arith.constant 0 : index
    %c0_41 = arith.constant 0 : index
    %44 = vector.load %arg3[%c0_39, %c1, %c0_40, %c0_41] : memref<1x4x6x16xf32, #tpu.memory_space<vmem>>, vector<1x1x3x16xf32>
    %45 = vector.shape_cast %44 : vector<1x1x3x16xf32> to vector<3x16xf32>
    %c0_42 = arith.constant 0 : index
    %c2 = arith.constant 2 : index
    %c0_43 = arith.constant 0 : index
    %c0_44 = arith.constant 0 : index
    %46 = vector.load %arg3[%c0_42, %c2, %c0_43, %c0_44] : memref<1x4x6x16xf32, #tpu.memory_space<vmem>>, vector<1x1x3x16xf32>
    %47 = vector.shape_cast %46 : vector<1x1x3x16xf32> to vector<3x16xf32>
    %c0_45 = arith.constant 0 : index
    %c3_46 = arith.constant 3 : index
    %c0_47 = arith.constant 0 : index
    %c0_48 = arith.constant 0 : index
    %48 = vector.load %arg3[%c0_45, %c3_46, %c0_47, %c0_48] : memref<1x4x6x16xf32, #tpu.memory_space<vmem>>, vector<1x1x3x16xf32>
    %49 = vector.shape_cast %48 : vector<1x1x3x16xf32> to vector<3x16xf32>
    %50 = tpu.concatenate %43, %45, %47, %49 in 1 : vector<3x16xf32>, vector<3x16xf32>, vector<3x16xf32>, vector<3x16xf32> -> vector<3x64xf32>
    %c0_49 = arith.constant 0 : index
    %c0_50 = arith.constant 0 : index
    %c3_51 = arith.constant 3 : index
    %c0_52 = arith.constant 0 : index
    %51 = vector.load %arg3[%c0_49, %c0_50, %c3_51, %c0_52] : memref<1x4x6x16xf32, #tpu.memory_space<vmem>>, vector<1x1x3x16xf32>
    %52 = vector.shape_cast %51 : vector<1x1x3x16xf32> to vector<3x16xf32>
    %c0_53 = arith.constant 0 : index
    %c1_54 = arith.constant 1 : index
    %c3_55 = arith.constant 3 : index
    %c0_56 = arith.constant 0 : index
    %53 = vector.load %arg3[%c0_53, %c1_54, %c3_55, %c0_56] : memref<1x4x6x16xf32, #tpu.memory_space<vmem>>, vector<1x1x3x16xf32>
    %54 = vector.shape_cast %53 : vector<1x1x3x16xf32> to vector<3x16xf32>
    %c0_57 = arith.constant 0 : index
    %c2_58 = arith.constant 2 : index
    %c3_59 = arith.constant 3 : index
    %c0_60 = arith.constant 0 : index
    %55 = vector.load %arg3[%c0_57, %c2_58, %c3_59, %c0_60] : memref<1x4x6x16xf32, #tpu.memory_space<vmem>>, vector<1x1x3x16xf32>
    %56 = vector.shape_cast %55 : vector<1x1x3x16xf32> to vector<3x16xf32>
    %c0_61 = arith.constant 0 : index
    %c3_62 = arith.constant 3 : index
    %c3_63 = arith.constant 3 : index
    %c0_64 = arith.constant 0 : index
    %57 = vector.load %arg3[%c0_61, %c3_62, %c3_63, %c0_64] : memref<1x4x6x16xf32, #tpu.memory_space<vmem>>, vector<1x1x3x16xf32>
    %58 = vector.shape_cast %57 : vector<1x1x3x16xf32> to vector<3x16xf32>
    %59 = tpu.concatenate %52, %54, %56, %58 in 1 : vector<3x16xf32>, vector<3x16xf32>, vector<3x16xf32>, vector<3x16xf32> -> vector<3x64xf32>
    %60 = tpu.concatenate %3, %3, %3, %3 in 1 : vector<3x16xf32>, vector<3x16xf32>, vector<3x16xf32>, vector<3x16xf32> -> vector<3x64xf32>
    %61 = arith.subf %59, %60 : vector<3x64xf32>
    %62 = vector.extract_strided_slice %61 {offsets = [0, 0], sizes = [1, 64], strides = [1, 1]} : vector<3x64xf32> to vector<1x64xf32>
    %63 = vector.extract_strided_slice %61 {offsets = [1, 0], sizes = [1, 64], strides = [1, 1]} : vector<3x64xf32> to vector<1x64xf32>
    %64 = vector.extract_strided_slice %61 {offsets = [2, 0], sizes = [1, 64], strides = [1, 1]} : vector<3x64xf32> to vector<1x64xf32>
    %65 = arith.mulf %62, %62 : vector<1x64xf32>
    %66 = arith.mulf %63, %63 : vector<1x64xf32>
    %67 = arith.addf %65, %66 : vector<1x64xf32>
    %68 = arith.mulf %64, %64 : vector<1x64xf32>
    %69 = arith.addf %67, %68 : vector<1x64xf32>
    %70 = math.sqrt %69 : vector<1x64xf32>
    %cst_65 = arith.constant 1.000000e-16 : f32
    %71 = vector.broadcast %cst_65 : f32 to vector<1x64xf32>
    %72 = arith.maximumf %70, %71 : vector<1x64xf32>
    %73 = arith.mulf %62, %62 : vector<1x64xf32>
    %74 = arith.mulf %63, %63 : vector<1x64xf32>
    %75 = arith.addf %73, %74 : vector<1x64xf32>
    %76 = math.sqrt %75 : vector<1x64xf32>
    %cst_66 = arith.constant 1.000000e-16 : f32
    %77 = vector.broadcast %cst_66 : f32 to vector<1x64xf32>
    %78 = arith.maximumf %76, %77 : vector<1x64xf32>
    %79 = arith.divf %64, %72 : vector<1x64xf32>
    %80 = arith.addf %62, %63 : vector<1x64xf32>
    %81 = arith.mulf %79, %80 : vector<1x64xf32>
    %82 = arith.divf %81, %78 : vector<1x64xf32>
    %c0_67 = arith.constant 0 : index
    %c0_68 = arith.constant 0 : index
    %83 = memref.load %arg18[%c0_67, %c0_68] : memref<1x2xf32, #tpu.memory_space<smem>>
    %84 = vector.broadcast %83 : f32 to vector<1x64xf32>
    %85 = arith.mulf %82, %84 : vector<1x64xf32>
    %c0_69 = arith.constant 0 : index
    %c1_70 = arith.constant 1 : index
    %86 = memref.load %arg18[%c0_69, %c1_70] : memref<1x2xf32, #tpu.memory_space<smem>>
    %87 = vector.broadcast %86 : f32 to vector<1x64xf32>
    %88 = arith.mulf %72, %87 : vector<1x64xf32>
    %89 = arith.addf %85, %88 : vector<1x64xf32>
    %c0_71 = arith.constant 0 : index
    %c0_72 = arith.constant 0 : index
    %90 = memref.load %arg19[%c0_71, %c0_72] : memref<1x1xf32, #tpu.memory_space<smem>>
    %91 = vector.broadcast %90 : f32 to vector<1x64xf32>
    %92 = arith.addf %89, %91 : vector<1x64xf32>
    %cst_73 = arith.constant 0.000000e+00 : f32
    %93 = vector.broadcast %cst_73 : f32 to vector<1x64xf32>
    %94 = arith.subf %93, %92 : vector<1x64xf32>
    %95 = math.exp %94 : vector<1x64xf32>
    %cst_74 = arith.constant 1.000000e+00 : f32
    %96 = vector.broadcast %cst_74 : f32 to vector<1x64xf32>
    %97 = arith.addf %96, %95 : vector<1x64xf32>
    %cst_75 = arith.constant 1.000000e+00 : f32
    %98 = vector.broadcast %cst_75 : f32 to vector<1x64xf32>
    %99 = arith.divf %98, %97 : vector<1x64xf32>
    %100 = vector.extract_strided_slice %99 {offsets = [0, 0], sizes = [1, 16], strides = [1, 1]} : vector<1x64xf32> to vector<1x16xf32>
    %101 = vector.extract_strided_slice %99 {offsets = [0, 16], sizes = [1, 16], strides = [1, 1]} : vector<1x64xf32> to vector<1x16xf32>
    %102 = vector.extract_strided_slice %99 {offsets = [0, 32], sizes = [1, 16], strides = [1, 1]} : vector<1x64xf32> to vector<1x16xf32>
    %103 = vector.extract_strided_slice %99 {offsets = [0, 48], sizes = [1, 16], strides = [1, 1]} : vector<1x64xf32> to vector<1x16xf32>
    %104 = tpu.concatenate %100, %101, %102, %103 in 0 : vector<1x16xf32>, vector<1x16xf32>, vector<1x16xf32>, vector<1x16xf32> -> vector<4x16xf32>
    %c0_76 = arith.constant 0 : index
    %c0_77 = arith.constant 0 : index
    %c0_78 = arith.constant 0 : index
    %105 = vector.load %arg21[%c0_76, %c0_77, %c0_78] : memref<1x4x16xf32, #tpu.memory_space<vmem>>, vector<1x4x16xf32>
    %106 = vector.shape_cast %105 : vector<1x4x16xf32> to vector<4x16xf32>
    %107 = vector.shape_cast %104 : vector<4x16xf32> to vector<1x4x16xf32>
    tpu.vector_store %arg21[%c0_76, %c0_77, %c0_78], %107 {strides = array<i32>} : memref<1x4x16xf32, #tpu.memory_space<vmem>>, vector<1x4x16xf32>,
    %108 = vector.extract_strided_slice %82 {offsets = [0, 0], sizes = [1, 16], strides = [1, 1]} : vector<1x64xf32> to vector<1x16xf32>
    %109 = vector.extract_strided_slice %82 {offsets = [0, 16], sizes = [1, 16], strides = [1, 1]} : vector<1x64xf32> to vector<1x16xf32>
    %110 = vector.extract_strided_slice %82 {offsets = [0, 32], sizes = [1, 16], strides = [1, 1]} : vector<1x64xf32> to vector<1x16xf32>
    %111 = vector.extract_strided_slice %82 {offsets = [0, 48], sizes = [1, 16], strides = [1, 1]} : vector<1x64xf32> to vector<1x16xf32>
    %112 = tpu.concatenate %108, %109, %110, %111 in 0 : vector<1x16xf32>, vector<1x16xf32>, vector<1x16xf32>, vector<1x16xf32> -> vector<4x16xf32>
    %c0_79 = arith.constant 0 : index
    %c0_80 = arith.constant 0 : index
    %c0_81 = arith.constant 0 : index
    %113 = vector.load %arg22[%c0_79, %c0_80, %c0_81] : memref<1x4x16xf32, #tpu.memory_space<vmem>>, vector<1x4x16xf32>
    %114 = vector.shape_cast %113 : vector<1x4x16xf32> to vector<4x16xf32>
    %115 = vector.shape_cast %112 : vector<4x16xf32> to vector<1x4x16xf32>
    tpu.vector_store %arg22[%c0_79, %c0_80, %c0_81], %115 {strides = array<i32>} : memref<1x4x16xf32, #tpu.memory_space<vmem>>, vector<1x4x16xf32>,
    %116 = vector.extract_strided_slice %4 {offsets = [0, 0], sizes = [24, 1], strides = [1, 1]} : vector<24x3xf32> to vector<24x1xf32>
    %117 = vector.extract_strided_slice %50 {offsets = [0, 0], sizes = [1, 64], strides = [1, 1]} : vector<3x64xf32> to vector<1x64xf32>
    %118 = vector.broadcast %116 : vector<24x1xf32> to vector<24x64xf32>
    %119 = vector.broadcast %117 : vector<1x64xf32> to vector<24x64xf32>
    %120 = arith.mulf %118, %119 : vector<24x64xf32>
    %121 = vector.extract_strided_slice %4 {offsets = [0, 1], sizes = [24, 1], strides = [1, 1]} : vector<24x3xf32> to vector<24x1xf32>
    %122 = vector.extract_strided_slice %50 {offsets = [1, 0], sizes = [1, 64], strides = [1, 1]} : vector<3x64xf32> to vector<1x64xf32>
    %123 = vector.broadcast %121 : vector<24x1xf32> to vector<24x64xf32>
    %124 = vector.broadcast %122 : vector<1x64xf32> to vector<24x64xf32>
    %125 = arith.mulf %123, %124 : vector<24x64xf32>
    %126 = arith.addf %120, %125 : vector<24x64xf32>
    %127 = vector.extract_strided_slice %4 {offsets = [0, 2], sizes = [24, 1], strides = [1, 1]} : vector<24x3xf32> to vector<24x1xf32>
    %128 = vector.extract_strided_slice %50 {offsets = [2, 0], sizes = [1, 64], strides = [1, 1]} : vector<3x64xf32> to vector<1x64xf32>
    %129 = vector.broadcast %127 : vector<24x1xf32> to vector<24x64xf32>
    %130 = vector.broadcast %128 : vector<1x64xf32> to vector<24x64xf32>
    %131 = arith.mulf %129, %130 : vector<24x64xf32>
    %132 = arith.addf %126, %131 : vector<24x64xf32>
    %133 = vector.broadcast %5 : vector<24x1xf32> to vector<24x64xf32>
    %134 = arith.addf %132, %133 : vector<24x64xf32>
    %cst_82 = arith.constant 0.000000e+00 : f32
    %135 = vector.broadcast %cst_82 : f32 to vector<24x64xf32>
    %136 = arith.maximumf %134, %135 : vector<24x64xf32>
    %137 = tpu.concatenate %38, %38, %38, %38 in 1 : vector<24x16xf32>, vector<24x16xf32>, vector<24x16xf32>, vector<24x16xf32> -> vector<24x64xf32>
    %cst_83 = arith.constant 1.000000e+00 : f32
    %138 = vector.broadcast %cst_83 : f32 to vector<1x64xf32>
    %139 = arith.addf %99, %138 : vector<1x64xf32>
    %140 = vector.broadcast %139 : vector<1x64xf32> to vector<24x64xf32>
    %141 = arith.mulf %136, %140 : vector<24x64xf32>
    %142 = arith.subf %141, %137 : vector<24x64xf32>
    %143 = tpu.concatenate %39, %39, %39, %39 in 1 : vector<16x16xf32>, vector<16x16xf32>, vector<16x16xf32>, vector<16x16xf32> -> vector<16x64xf32>
    %144 = tpu.concatenate %40, %40, %40, %40 in 1 : vector<16x16xf32>, vector<16x16xf32>, vector<16x16xf32>, vector<16x16xf32> -> vector<16x64xf32>
    %145 = tpu.concatenate %41, %41, %41, %41 in 1 : vector<60x16xf32>, vector<60x16xf32>, vector<60x16xf32>, vector<60x16xf32> -> vector<60x64xf32>
    %146 = vector.extract_strided_slice %6 {offsets = [0, 0], sizes = [16, 1], strides = [1, 1]} : vector<16x3xf32> to vector<16x1xf32>
    %147 = vector.extract_strided_slice %61 {offsets = [0, 0], sizes = [1, 64], strides = [1, 1]} : vector<3x64xf32> to vector<1x64xf32>
    %148 = vector.broadcast %146 : vector<16x1xf32> to vector<16x64xf32>
    %149 = vector.broadcast %147 : vector<1x64xf32> to vector<16x64xf32>
    %150 = arith.mulf %148, %149 : vector<16x64xf32>
    %151 = vector.extract_strided_slice %6 {offsets = [0, 1], sizes = [16, 1], strides = [1, 1]} : vector<16x3xf32> to vector<16x1xf32>
    %152 = vector.extract_strided_slice %61 {offsets = [1, 0], sizes = [1, 64], strides = [1, 1]} : vector<3x64xf32> to vector<1x64xf32>
    %153 = vector.broadcast %151 : vector<16x1xf32> to vector<16x64xf32>
    %154 = vector.broadcast %152 : vector<1x64xf32> to vector<16x64xf32>
    %155 = arith.mulf %153, %154 : vector<16x64xf32>
    %156 = arith.addf %150, %155 : vector<16x64xf32>
    %157 = vector.extract_strided_slice %6 {offsets = [0, 2], sizes = [16, 1], strides = [1, 1]} : vector<16x3xf32> to vector<16x1xf32>
    %158 = vector.extract_strided_slice %61 {offsets = [2, 0], sizes = [1, 64], strides = [1, 1]} : vector<3x64xf32> to vector<1x64xf32>
    %159 = vector.broadcast %157 : vector<16x1xf32> to vector<16x64xf32>
    %160 = vector.broadcast %158 : vector<1x64xf32> to vector<16x64xf32>
    %161 = arith.mulf %159, %160 : vector<16x64xf32>
    %162 = arith.addf %156, %161 : vector<16x64xf32>
    %cst_84 = arith.constant dense<0.000000e+00> : vector<16x64xf32>
    %163 = tpu.matmul %7, %142, %cst_84 {dimension_numbers = #tpu.dot_dimension_numbers<[1], [0], [0], [1], [0, 0, 1, 1], [], []>} : vector<16x24xf32>, vector<24x64xf32>, vector<16x64xf32> -> vector<16x64xf32>
    %164 = arith.addf %162, %163 : vector<16x64xf32>
    %165 = vector.broadcast %8 : vector<16x1xf32> to vector<16x64xf32>
    %166 = arith.addf %164, %165 : vector<16x64xf32>
    %cst_85 = arith.constant 0.000000e+00 : f32
    %167 = vector.broadcast %cst_85 : f32 to vector<16x64xf32>
    %168 = arith.maximumf %166, %167 : vector<16x64xf32>
    %cst_86 = arith.constant dense<0.000000e+00> : vector<16x64xf32>
    %169 = tpu.matmul %9, %168, %cst_86 {dimension_numbers = #tpu.dot_dimension_numbers<[1], [0], [0], [1], [0, 0, 1, 1], [], []>} : vector<16x16xf32>, vector<16x64xf32>, vector<16x64xf32> -> vector<16x64xf32>
    %170 = arith.addf %169, %143 : vector<16x64xf32>
    %171 = vector.broadcast %11 : vector<16x1xf32> to vector<16x64xf32>
    %172 = arith.addf %170, %171 : vector<16x64xf32>
    %cst_87 = arith.constant 0.000000e+00 : f32
    %173 = vector.broadcast %cst_87 : f32 to vector<16x64xf32>
    %174 = arith.maximumf %172, %173 : vector<16x64xf32>
    %175 = tpu.concatenate %174, %168 in 0 : vector<16x64xf32>, vector<16x64xf32> -> vector<32x64xf32>
    %cst_88 = arith.constant dense<0.000000e+00> : vector<16x64xf32>
    %176 = tpu.matmul %12, %175, %cst_88 {dimension_numbers = #tpu.dot_dimension_numbers<[1], [0], [0], [1], [0, 0, 1, 1], [], []>} : vector<16x32xf32>, vector<32x64xf32>, vector<16x64xf32> -> vector<16x64xf32>
    %177 = arith.addf %176, %144 : vector<16x64xf32>
    %178 = vector.broadcast %14 : vector<16x1xf32> to vector<16x64xf32>
    %179 = arith.addf %177, %178 : vector<16x64xf32>
    %cst_89 = arith.constant 0.000000e+00 : f32
    %180 = vector.broadcast %cst_89 : f32 to vector<16x64xf32>
    %181 = arith.maximumf %179, %180 : vector<16x64xf32>
    %182 = tpu.concatenate %181, %174, %168 in 0 : vector<16x64xf32>, vector<16x64xf32>, vector<16x64xf32> -> vector<48x64xf32>
    %cst_90 = arith.constant dense<0.000000e+00> : vector<60x64xf32>
    %183 = tpu.matmul %15, %182, %cst_90 {dimension_numbers = #tpu.dot_dimension_numbers<[1], [0], [0], [1], [0, 0, 1, 1], [], []>} : vector<60x48xf32>, vector<48x64xf32>, vector<60x64xf32> -> vector<60x64xf32>
    %184 = arith.addf %183, %145 : vector<60x64xf32>
    %185 = vector.broadcast %17 : vector<60x1xf32> to vector<60x64xf32>
    %186 = arith.addf %184, %185 : vector<60x64xf32>
    %187 = vector.extract_strided_slice %186 {offsets = [0, 0], sizes = [60, 16], strides = [1, 1]} : vector<60x64xf32> to vector<60x16xf32>
    %188 = vector.extract_strided_slice %186 {offsets = [0, 16], sizes = [60, 16], strides = [1, 1]} : vector<60x64xf32> to vector<60x16xf32>
    %189 = arith.maximumf %187, %188 : vector<60x16xf32>
    %190 = vector.extract_strided_slice %186 {offsets = [0, 32], sizes = [60, 16], strides = [1, 1]} : vector<60x64xf32> to vector<60x16xf32>
    %191 = arith.maximumf %189, %190 : vector<60x16xf32>
    %192 = vector.extract_strided_slice %186 {offsets = [0, 48], sizes = [60, 16], strides = [1, 1]} : vector<60x64xf32> to vector<60x16xf32>
    %193 = arith.maximumf %191, %192 : vector<60x16xf32>
    %c0_91 = arith.constant 0 : index
    %c0_92 = arith.constant 0 : index
    %c0_93 = arith.constant 0 : index
    %194 = vector.load %arg20[%c0_91, %c0_92, %c0_93] : memref<1x60x16xf32, #tpu.memory_space<vmem>>, vector<1x60x16xf32>
    %195 = vector.shape_cast %194 : vector<1x60x16xf32> to vector<60x16xf32>
    %196 = vector.shape_cast %193 : vector<60x16xf32> to vector<1x60x16xf32>
    tpu.vector_store %arg20[%c0_91, %c0_92, %c0_93], %196 {strides = array<i32>} : memref<1x60x16xf32, #tpu.memory_space<vmem>>, vector<1x60x16xf32>,
    return
  }
  func.func @transform_0(%arg0: i32, %arg1: i32) -> (i32, i32, i32) {
    %c0_i32 = arith.constant 0 : i32
    %c0_i32_0 = arith.constant 0 : i32
    return %arg0, %c0_i32, %arg1 : i32, i32, i32
  }
  func.func @transform_1(%arg0: i32, %arg1: i32) -> (i32, i32, i32, i32) {
    %c0_i32 = arith.constant 0 : i32
    %c0_i32_0 = arith.constant 0 : i32
    %c0_i32_1 = arith.constant 0 : i32
    return %arg0, %c0_i32, %c0_i32_0, %arg1 : i32, i32, i32, i32
  }
  func.func @transform_2(%arg0: i32, %arg1: i32) -> (i32, i32) {
    %c0_i32 = arith.constant 0 : i32
    %c0_i32_0 = arith.constant 0 : i32
    %c0_i32_1 = arith.constant 0 : i32
    return %c0_i32, %c0_i32_0 : i32, i32
  }
  func.func @transform_3(%arg0: i32, %arg1: i32) -> (i32, i32) {
    %c0_i32 = arith.constant 0 : i32
    %c0_i32_0 = arith.constant 0 : i32
    %c0_i32_1 = arith.constant 0 : i32
    return %c0_i32, %c0_i32_0 : i32, i32
  }
  func.func @transform_4(%arg0: i32, %arg1: i32) -> (i32, i32) {
    %c0_i32 = arith.constant 0 : i32
    %c0_i32_0 = arith.constant 0 : i32
    %c0_i32_1 = arith.constant 0 : i32
    return %c0_i32, %c0_i32_0 : i32, i32
  }
  func.func @transform_5(%arg0: i32, %arg1: i32) -> (i32, i32) {
    %c0_i32 = arith.constant 0 : i32
    %c0_i32_0 = arith.constant 0 : i32
    %c0_i32_1 = arith.constant 0 : i32
    return %c0_i32, %c0_i32_0 : i32, i32
  }
  func.func @transform_6(%arg0: i32, %arg1: i32) -> (i32, i32) {
    %c0_i32 = arith.constant 0 : i32
    %c0_i32_0 = arith.constant 0 : i32
    %c0_i32_1 = arith.constant 0 : i32
    return %c0_i32, %c0_i32_0 : i32, i32
  }
  func.func @transform_7(%arg0: i32, %arg1: i32) -> (i32, i32) {
    %c0_i32 = arith.constant 0 : i32
    %c0_i32_0 = arith.constant 0 : i32
    %c0_i32_1 = arith.constant 0 : i32
    return %c0_i32, %c0_i32_0 : i32, i32
  }
  func.func @transform_8(%arg0: i32, %arg1: i32) -> (i32, i32) {
    %c0_i32 = arith.constant 0 : i32
    %c0_i32_0 = arith.constant 0 : i32
    %c0_i32_1 = arith.constant 0 : i32
    return %c0_i32, %c0_i32_0 : i32, i32
  }
  func.func @transform_9(%arg0: i32, %arg1: i32) -> (i32, i32) {
    %c0_i32 = arith.constant 0 : i32
    %c0_i32_0 = arith.constant 0 : i32
    %c0_i32_1 = arith.constant 0 : i32
    return %c0_i32, %c0_i32_0 : i32, i32
  }
  func.func @transform_10(%arg0: i32, %arg1: i32) -> (i32, i32) {
    %c0_i32 = arith.constant 0 : i32
    %c0_i32_0 = arith.constant 0 : i32
    %c0_i32_1 = arith.constant 0 : i32
    return %c0_i32, %c0_i32_0 : i32, i32
  }
  func.func @transform_11(%arg0: i32, %arg1: i32) -> (i32, i32) {
    %c0_i32 = arith.constant 0 : i32
    %c0_i32_0 = arith.constant 0 : i32
    %c0_i32_1 = arith.constant 0 : i32
    return %c0_i32, %c0_i32_0 : i32, i32
  }
  func.func @transform_12(%arg0: i32, %arg1: i32) -> (i32, i32) {
    %c0_i32 = arith.constant 0 : i32
    %c0_i32_0 = arith.constant 0 : i32
    %c0_i32_1 = arith.constant 0 : i32
    return %c0_i32, %c0_i32_0 : i32, i32
  }
  func.func @transform_13(%arg0: i32, %arg1: i32) -> (i32, i32) {
    %c0_i32 = arith.constant 0 : i32
    %c0_i32_0 = arith.constant 0 : i32
    %c0_i32_1 = arith.constant 0 : i32
    return %c0_i32, %c0_i32_0 : i32, i32
  }
  func.func @transform_14(%arg0: i32, %arg1: i32) -> (i32, i32) {
    %c0_i32 = arith.constant 0 : i32
    %c0_i32_0 = arith.constant 0 : i32
    %c0_i32_1 = arith.constant 0 : i32
    return %c0_i32, %c0_i32_0 : i32, i32
  }
  func.func @transform_15(%arg0: i32, %arg1: i32) -> (i32, i32) {
    %c0_i32 = arith.constant 0 : i32
    %c0_i32_0 = arith.constant 0 : i32
    %c0_i32_1 = arith.constant 0 : i32
    return %c0_i32, %c0_i32_0 : i32, i32
  }
  func.func @transform_16(%arg0: i32, %arg1: i32) -> (i32, i32) {
    %c0_i32 = arith.constant 0 : i32
    %c0_i32_0 = arith.constant 0 : i32
    %c0_i32_1 = arith.constant 0 : i32
    return %c0_i32, %c0_i32_0 : i32, i32
  }
  func.func @transform_17(%arg0: i32, %arg1: i32) -> (i32, i32) {
    %c0_i32 = arith.constant 0 : i32
    %c0_i32_0 = arith.constant 0 : i32
    %c0_i32_1 = arith.constant 0 : i32
    return %c0_i32, %c0_i32_0 : i32, i32
  }
  func.func @transform_18(%arg0: i32, %arg1: i32) -> (i32, i32, i32) {
    %c0_i32 = arith.constant 0 : i32
    %c0_i32_0 = arith.constant 0 : i32
    return %arg0, %c0_i32, %arg1 : i32, i32, i32
  }
  func.func @transform_19(%arg0: i32, %arg1: i32) -> (i32, i32, i32) {
    %c0_i32 = arith.constant 0 : i32
    %c0_i32_0 = arith.constant 0 : i32
    return %arg0, %c0_i32, %arg1 : i32, i32, i32
  }
  func.func @transform_20(%arg0: i32, %arg1: i32) -> (i32, i32, i32) {
    %c0_i32 = arith.constant 0 : i32
    %c0_i32_0 = arith.constant 0 : i32
    return %arg0, %c0_i32, %arg1 : i32, i32, i32
  }
}

</mosaic_0001>

<bundles_post_ra>
// kernel: encode_forward.1
= control target key start
LH: loop header
LB: loop body
LE: loop exit
PB: predicated region body
PF: predicated region fallthrough
CT: control target
= control target key end

     0   :  { %s3269_s0 = inlined_call_operand.vmem [shape: f32[2,6,16], index: 0, kind: input, shape index: {}]   ;;  %s3270_s1 = inlined_call_operand.vmem [shape: f32[2,4,6,16], index: 1, kind: input, shape index: {}]   ;;  %s3271_s2 = inlined_call_operand.vmem [shape: f32[24,3], index: 2, kind: input, shape index: {}]   ;;  %s3272_s3 = inlined_call_operand.vmem [shape: f32[24,1], index: 3, kind: input, shape index: {}]   ;;  %s3273_s4 = inlined_call_operand.vmem [shape: f32[16,3], index: 4, kind: input, shape index: {}]   ;;  %s3274_s5 = inlined_call_operand.vmem [shape: f32[16,24], index: 5, kind: input, shape index: {}]   ;;  %s3275_s6 = inlined_call_operand.vmem [shape: f32[16,1], index: 6, kind: input, shape index: {}]   ;;  %s3276_s7 = inlined_call_operand.vmem [shape: f32[16,16], index: 7, kind: input, shape index: {}]   ;;  %s3277_s8 = inlined_call_operand.vmem [shape: f32[16,24], index: 8, kind: input, shape index: {}]   ;;  %s3278_s9 = inlined_call_operand.vmem [shape: f32[16,1], index: 9, kind: input, shape index: {}]   ;;  %s3279_s10 = inlined_call_operand.vmem [shape: f32[16,32], index: 10, kind: input, shape index: {}]   ;;  %s3280_s11 = inlined_call_operand.vmem [shape: f32[16,24], index: 11, kind: input, shape index: {}]   ;;  %s3281_s12 = inlined_call_operand.vmem [shape: f32[16,1], index: 12, kind: input, shape index: {}]   ;;  %s3282_s13 = inlined_call_operand.vmem [shape: f32[60,48], index: 13, kind: input, shape index: {}]   ;;  %s3283_s14 = inlined_call_operand.vmem [shape: f32[60,24], index: 14, kind: input, shape index: {}]   ;;  %s3284_s15 = inlined_call_operand.vmem [shape: f32[60,1], index: 15, kind: input, shape index: {}]   ;;  %s3285_s16 = inlined_call_operand.vmem [shape: f32[1,2], index: 16, kind: input, shape index: {}]   ;;  %s3286_s17 = inlined_call_operand.<no memory space> [shape: f32[1,1], index: 17, kind: input, shape index: {}]   ;;  %s3287_s18 = inlined_call_operand.vmem [shape: f32[2,60,16], index: 18, kind: output, shape index: {0}]   ;;  %s3288_s19 = inlined_call_operand.hbm [shape: f32[2,4,16], index: 19, kind: output, shape index: {1}]   ;;  %s3289_s20 = inlined_call_operand.hbm [shape: f32[2,4,16], index: 20, kind: output, shape index: {2}]  }
   0x1   :  { %3315 = sst [smem:[#allocation19_spill]] %s3269_s0 }
   0x2   :  { %3316 = sst [smem:[#allocation20_spill]] %s3270_s1 }
   0x3   :  { %3317 = sst [smem:[#allocation21_spill]] %s3271_s2 }
   0x4   :  { %3318 = sst [smem:[#allocation22_spill]] %s3272_s3 }
   0x5   :  { %3319 = sst [smem:[#allocation23_spill]] %s3273_s4 }
   0x6   :  { %3320 = sst [smem:[#allocation24_spill]] %s3274_s5 }
   0x7   :  { %3321 = sst [smem:[#allocation25_spill]] %s3275_s6 }
   0x8   :  { %3322 = sst [smem:[#allocation26_spill]] %s3276_s7 }
   0x9   :  { %3323 = sst [smem:[#allocation27_spill]] %s3277_s8 }
   0xa   :  { %3324 = sst [smem:[#allocation28_spill]] %s3285_s16 }
   0xb   :  { %3325 = sst [smem:[#allocation29_spill]] %s3287_s18 }
   0xc   :  { %26 = sst [smem:[#allocation2]] %s3286_s17 }
   0xd   :  { %27 = vsyncpa [#allocation5], 0 }
   0xe   :  { %28 = vsyncpa [#allocation4], 0 }
   0xf   :  { %30 = vsyncpa [#allocation4 + $0x1], 0 }
  0x10   :  { %31 = vsyncpa [#allocation8], 0 }
  0x11   :  { %33 = vsyncpa [#allocation8 + $0x1], 0  ;;  %s2452_s23 = smov 0   ;;  %s2454_s24 = smov 0  }
  0x12   :  { %s2456_s2 = smov 0   ;;  %s2458_s25 = smov 0  }
  0x13   :  { %s2460_s3 = smov 0   ;;  %s2462_s26 = smov 0  }
  0x14 LB: > { %3326 = sst [smem:[#allocation12_spill]] %s2312_s23  ;;  %s2030_s17 = sadd.s32 4294967295, %s2332_s26   ;;  %s2332_s26 = sphi %s2462_s26, %s39_s26   ;;  %s2328_s3 = sphi %s2460_s3, %s3360_s3   ;;  %s2324_s25 = sphi %s2458_s25, %s3359_s25   ;;  %s2320_s2 = sphi %s2456_s2, %s3358_s2   ;;  %s2316_s24 = sphi %s2454_s24, %s3362_s24   ;;  %s2312_s23 = sphi %s2452_s23, %s3361_s23  }
  0x15   : > { %3327 = sst [smem:[#allocation13_spill]] %s2320_s2  ;;  %s2031_s27 = sadd.s32 4294967294, %s2332_s26  }
  0x16   : > { %3328 = sst [smem:[#allocation14_spill]] %s2328_s3  ;;  %s51_s28 = sadd.s32 1, %s2328_s3 }
  0x17   : > { %3329 = sst [smem:[#allocation15_spill]] %s2332_s26  ;;  %s480_s4 = sadd.s32 1, %s2320_s2 }
  0x18   : > { %p53_p0 = scmp.ge.s32.totalorder %s51_s28, 2  ;;  %p490_p1 = scmp.ne.s32.totalorder %s2320_s2, %s2316_s24 }
  0x19   : > { %p491_p2 = scmp.eq.s32.totalorder %s2030_s17, 1  ;;  %p496_p3 = scmp.ne.s32.totalorder %s2316_s24, %s2312_s23 }
  0x1a   : > { %s3364_s28 = smov (%p53_p0, %s51_s28), 0  ;;  %p497_p5 = scmp.eq.s32.totalorder %s2031_s27, 1 }
  0x1b   : > { %3330 = sst [smem:[#allocation16_spill]] %s3364_s28  ;;  %p2492_p4 = por %p491_p2, %p490_p1 }
  0x1c   : > { %s475_s30 = ssub.s32 %s2328_s3, %s3364_s28  ;;  %p2032_p6 = scmp.ge.s32.totalorder %s2332_s26, 1 }
  0x1d   : > { %p478_p7 = scmp.eq.s32.totalorder %s475_s30, 0  ;;  %p2499_p8 = por %p497_p5, %p496_p3 }
  0x1e   : > { %p532_p9 = scmp.lt.s32.totalorder %s2332_s26, 3  ;;  %p2116_p11 = scmp.eq.s32.totalorder %s2030_s17, 0 }
  0x1f   : > { %s3332_s0 = scalar_select %p2499_p8, 1, 0 }
  0x20   : > { %s2505_s21 = scalar_select %p478_p7, %s2320_s2, %s480_s4  }
  0x21   : > { %3333 = sst [smem:[#allocation17_spill]] %s3332_s0  ;;  %p533_p10 = pnand %p2032_p6, %p532_p9 }
  0x22   : > { %3334 = sst [smem:[#allocation18_spill]] %s2505_s21  ;;  %s2334_s27 = smov [#allocation3]  }
  0x23   : > { %s3335_s16 = sld [smem:[#allocation28_spill]]  ;;  %p2105_p12 = pneg %p533_p10 }
  0x25   : > { %p2106_p13 = pnand %p2116_p11, %p2105_p12 }
  0x26   : > { %623 = sbr.rel (%p533_p10) target bundleno = 1092 (0x444), region = 92 }
  0x29   : > { %s586_s23 = sshll.u32 %s3335_s16, 4  ;;  %s587_s23 = int_to_ptr.vmem [resolvable:$true] %s586_s23 }
  0x2a   : > { %2108 = dma.vmem_to_smem (!%p2106_p13), %s587_s23, 16, %s2334_s27, [#allocation5]  }
  0x2b   : > { %2299 = dma.done.wait (%p2116_p11), [#allocation5], 16  }
  0x2c   : > { %2301 = vsyncadd (%p2116_p11), [#allocation5], 4294967280 }
  0x2d   : > { %630 = sfence }
  0x2e   : > { %p706_p0 = scmp.lt.s32.totalorder %s2324_s25, 1  ;;  %v2335_v0 = vmov 1   ;;  %v2336_v1 = vmov 0   ;;  %s3336_s1 = sld [smem:[#allocation20_spill]]  ;;  %v2340_v9 = vmov 2   ;;  %vm1000_vm0 = vcmask 130048  }
  0x2f   : > { %2178 = vset.pattern.permute.xlu1 %v2335_v0  ;;  %2177 = vset.pattern.permute.xlu0 %v2336_v1  ;;  %s3308_s16 = smov 32   ;;  %s3310_s28 = smov 16   ;;  %vm1002_vm1 = vcmask 261120   ;;  %vm1004_vm2 = vcmask 392192   ;;  %vm857_vm7 = vcmask 195584  }
  0x30   : > { %s2514_s17 = scalar_select %p706_p0, %s2324_s25, 1  ;;  %2179 = vset.pattern.permute.xlu2 %v2336_v1 }
  0x31   : > { %s3306_s3 = smov 48   ;;  %s3338_s0 = sld [smem:[#allocation21_spill]] }
  0x32   : > { %s2083_s23 = sshll.u32 %s2514_s17, 5  ;;  %s2039_s27 = sshll.u32 %s2514_s17, 3 }
  0x33   : > { %s3339_s26 = sld [smem:[#allocation22_spill]]  ;;  %s2921_s21 = sand.u32 1, %s2316_s24  }
  0x34   : > { %s2521_s22 = scalar_lea.vmem %s3336_s1, %s2083_s23  ;;  %s3337_s23 = sld [smem:[#allocation19_spill]] }
  0x35   : > { %v2060_v2 = vld [vmem:[%s2521_s22 + $0x13] sm:$0x7]  ;;  %v2059_v3 = vld [vmem:[%s2521_s22 + $0xb] sm:$0x7]  ;;  %v2061_v4 = vld [vmem:[%s2521_s22 + $0x1b] sm:$0x7] }
  0x36   : > { %1015 = vrot.lane.b32.xlu1 %v2060_v2, %s3308_s16  ;;  %1011 = vrot.lane.b32.xlu0 %v2059_v3, %s3310_s28  ;;  %v2057_v11 = vld [vmem:[%s2521_s22 + $0x10] sm:$0x7]  ;;  %v2056_v14 = vld [vmem:[%s2521_s22 + $0x8] sm:$0x7]  ;;  %s3341_s8 = sld [smem:[#allocation27_spill]] }
  0x37   : > { %1019 = vrot.lane.b32.xlu2 %v2061_v4, %s3306_s3  ;;  %v733_v6 = vld [vmem:[%s3338_s0 + $0x10] sm:$0xff]  ;;  %v732_v7 = vld [vmem:[%s3338_s0 + $0x8] sm:$0xff]  ;;  %v731_v8 = vld [vmem:[%s3338_s0] sm:$0xff]  ;;  %s3342_s2 = sld [smem:[#allocation23_spill]]  ;;  %s2238_s0 = scalar_lea.hbm %s3288_s19, 8 }
  0x38   : > { %v2058_v15 = vld [vmem:[%s2521_s22 + $0x18] sm:$0x7]  ;;  %v1006_v21 = vld [vmem:[%s2521_s22 + $0x3] sm:$0x7]  ;;  %s1127_s18 = sld [smem:[#allocation2]] }
  0x39   : > { %s3340_s4 = smov %s3339_s26  ;;  %v736_v10 = vld [vmem:[%s3339_s26 + $0x10] sm:$0xff]  ;;  %s3344_s6 = sld [smem:[#allocation25_spill]] }
  0x3a   : > { %s2533_s30 = scalar_lea.vmem %s3337_s23, %s2039_s27  ;;  %v735_v12 = vld [vmem:[%s3340_s4 + $0x8] sm:$0xff]  ;;  %v734_v13 = vld [vmem:[%s3340_s4] sm:$0xff]  ;;  %s3345_s5 = sld [smem:[#allocation24_spill]] }
  0x3b   : > { %v730_v5 = vld [vmem:[%s2533_s30 + $0x3] sm:$0x7]  ;;  %v729_v35 = vld [vmem:[%s2533_s30] sm:$0x7]  ;;  %s1117_s30 = sld [smem:[#allocation3]]  ;;  %s3300_s26 = smov 112  }
  0x3c   : > { %v794_v40 = vperm.slane %v729_v35, 0  ;;  %v829_v41 = vperm.slane %v729_v35, 2  ;;  %v810_v42 = vperm.slane %v729_v35, 1  ;;  %s3302_s23 = smov 96   ;;  %s3346_s7 = sld [smem:[#allocation26_spill]] }
  0x3d   : > { %s3343_s1 = smov %s3342_s2  ;;  %s2037_s27 = sshll.u32 %s2921_s21, 2 }
  0x3e   : > { %1029 = vrot.lane.b32.xlu1 %v730_v5, %s3308_s16  ;;  %1026 = vrot.lane.b32.xlu0 %v730_v5, %s3310_s28 }
  0x3f   : > { %1032 = vrot.lane.b32.xlu2 %v730_v5, %s3306_s3 }
  0x46   : > { %807 = vperm.xlu1 %2178, %v733_v6   ;;  %791 = vperm.xlu0 %2177, %v733_v6  }
  0x47   : > { %786 = vperm.xlu2 %2179, %v732_v7  }
  0x4e   : > { %803 = vperm.xlu1 %2178, %v732_v7   ;;  %781 = vperm.xlu0 %2177, %v731_v8  }
  0x4f   : > { %2180 = vset.pattern.permute.xlu2 %v2340_v9 }
  0x50   : > { %826 = vperm.xlu2 %2180, %v733_v6  }
  0x56   : > { %799 = vperm.xlu1 %2178, %v731_v8   ;;  %2181 = vset.pattern.permute.xlu0 %v2340_v9 }
  0x57   : > { %818 = vperm.xlu0 %2181, %v731_v8  }
  0x58   : > { %822 = vperm.xlu2 %2180, %v732_v7  }
  0x5e   : > { %2182 = vset.pattern.permute.xlu1 %v2336_v1 }
  0x5f   : > { %848 = vperm.xlu1 %2182, %v736_v10   ;;  %993 = vrot.lane.b32.xlu0 %v2057_v11, %s3308_s16 }
  0x60   : > { %2183 = vset.pattern.permute.xlu2 %v2336_v1  ;;  %2184 = vset.pattern.permute.xlu0 %v2335_v0 }
  0x61   : > { %843 = vperm.xlu2 %2183, %v735_v12  }
  0x67   : > { %838 = vperm.xlu1 %2182, %v734_v13  }
  0x69   : > { %989 = vrot.lane.b32.xlu2 %v2056_v14, %s3310_s28 }
  0x6f   : > { %997 = vrot.lane.b32.xlu1 %v2058_v15, %s3306_s3 }
  0x91   : > { %v1020_v16 = vpop.permute.xlu2 %1019 }
  0x99   : > { %v1033_v17 = vpop.permute.xlu2 %1032 }
  0xa1   : > { %v2568_v18 = vpop.permute.xlu2 %786 }
  0xa2   : > { %v796_v45 = vmul.f32 %v794_v40, %v2568_v18 }
  0xa8   : > { %v1016_v19 = vpop.permute.xlu1 %1015  ;;  %v1012_v20 = vpop.permute.xlu0 %1011 }
  0xa9   : > { %v1022_v22 = vsel %vm1000_vm0, %v1006_v21, %v1012_v20 }
  0xaa   : > { %v2572_v23 = vpop.permute.xlu2 %826  ;;  %v1023_v24 = vsel %vm1002_vm1, %v1022_v22, %v1016_v19 }
  0xab   : > { %v1024_v29 = vsel %vm1004_vm2, %v1023_v24, %v1020_v16  ;;  %v832_v6 = vmul.f32 %v829_v41, %v2572_v23 }
  0xb0   : > { %v1030_v25 = vpop.permute.xlu1 %1029  ;;  %v1027_v26 = vpop.permute.xlu0 %1026 }
  0xb1   : > { %v1035_v27 = vsel %vm1000_vm0, %v730_v5, %v1027_v26 }
  0xb2   : > { %v1036_v28 = vsel %vm1002_vm1, %v1035_v27, %v1030_v25  ;;  %v2586_v38 = vpop.permute.xlu2 %822 }
  0xb3   : > { %v1037_v30 = vsel %vm1004_vm2, %v1036_v28, %v1033_v17  ;;  %v831_v46 = vmul.f32 %v829_v41, %v2586_v38 }
  0xb4   : > { %v2579_v31 = vsub.f32 %v1024_v29, %v1037_v30 }
  0xb6   : > { %v1039_v32 = vmul.f32 %v2579_v31, %v2579_v31 }
  0xb8   : > { %v1041_v33 = vrot.slane %v1039_v32, 1  ;;  %v2583_v34 = vpop.permute.xlu1 %807  ;;  %v1044_v37 = vrot.slane %v1039_v32, 2  ;;  %v2588_v43 = vpop.permute.xlu0 %791 }
  0xb9   : > { %v813_v60 = vmul.f32 %v810_v42, %v2583_v34  ;;  %v797_v61 = vmul.f32 %v794_v40, %v2588_v43 }
  0xba   : > { %v1043_v36 = vadd.f32 %v1041_v33, %v1039_v32 }
  0xbb   : > { %v2595_v52 = vpop.permute.xlu2 %843  ;;  %v816_v7 = vadd.f32 %v813_v60, %v797_v61 }
  0xbc   : > { %v1046_v39 = vadd.f32 %v1044_v37, %v1043_v36  ;;  %2191 = vrsqrt.f32 %v1043_v36  ;;  %vm1067_vm3 = vcmp.eq.f32.partialorder %v1043_v36, inf  ;;  %v1070_v21 = vand.u32 2147483648, %v1043_v36 }
  0xbd   : > { %v835_v14 = vadd.f32 %v832_v6, %v816_v7  ;;  %vm1069_vm6 = vcmp.eq.f32.partialorder %v1043_v36, 0.0 }
  0xbe   : > { %2193 = vrsqrt.f32 %v1046_v39  ;;  %vm1054_vm4 = vcmp.eq.f32.partialorder %v1046_v39, inf  ;;  %v1057_v12 = vand.u32 2147483648, %v1046_v39  ;;  %vm1056_vm5 = vcmp.eq.f32.partialorder %v1046_v39, 0.0 }
  0xc0   : > { %v2590_v44 = vpop.permute.xlu1 %803  ;;  %v2597_v58 = vpop.permute.xlu0 %781 }
  0xc1   : > { %v812_v47 = vmul.f32 %v810_v42, %v2590_v44  ;;  %v795_v22 = vmul.f32 %v794_v40, %v2597_v58 }
  0xc2   : > { %v2192_v48 = vpop.eup %2191 }
  0xc3   : > { %v1061_v49 = vmul.f32 %v2192_v48, %v1043_v36  ;;  %v815_v50 = vadd.f32 %v812_v47, %v796_v45  ;;  %v990_v37 = vpop.permute.xlu2 %989  ;;  %v746_v47 = vld [vmem:[%s3341_s8 + $0x8] sm:$0xff] }
  0xc4   : > { %v2194_v51 = vpop.eup %2193 }
  0xc5   : > { %v1048_v53 = vmul.f32 %v2194_v51, %v1046_v39  ;;  %v1062_v54 = vmul.f32 %v2192_v48, %v1061_v49  ;;  %v834_v55 = vadd.f32 %v831_v46, %v815_v50 }
  0xc7   : > { %v1049_v56 = vmul.f32 %v2194_v51, %v1048_v53  ;;  %v1063_v57 = vmul.f32 0.5, %v1062_v54  ;;  %v852_v59 = vadd.f32 %v2595_v52, %v834_v55  ;;  %v764_v53 = vld [vmem:[%s3283_s14 + $0x8] sm:$0xff] }
  0xc8   : > { %v2602_v62 = vpop.permute.xlu1 %799 }
  0xc9   : > { %v1050_v63 = vmul.f32 0.5, %v1049_v56  ;;  %v1064_v2 = vsub.f32 1.5, %v1063_v57  ;;  %v2604_v3 = vmax.f32 %v852_v59, 0.0  ;;  %v811_v13 = vmul.f32 %v810_v42, %v2602_v62  ;;  %v2610_v17 = vpop.permute.xlu0 %818 }
  0xca   : > { %v830_v28 = vmul.f32 %v829_v41, %v2610_v17 }
  0xcb   : > { %v1051_v4 = vsub.f32 1.5, %v1050_v63  ;;  %v1065_v5 = vmul.f32 %v2192_v48, %v1064_v2  ;;  %1218 = vrot.lane.b32.xlu1 %v2604_v3, %s3310_s28  ;;  %v814_v27 = vadd.f32 %v811_v13, %v795_v22  ;;  %v745_v48 = vld [vmem:[%s3341_s8] sm:$0xff] }
  0xcc   : > { %v737_v22 = vld [vmem:[%s3343_s1] sm:$0xff] }
  0xcd   : > { %v1052_v8 = vmul.f32 %v2194_v51, %v1051_v4  ;;  %v1066_v10 = vmul.f32 %v1065_v5, %v1043_v36  ;;  %v833_v33 = vadd.f32 %v830_v28, %v814_v27  ;;  %v1092_v28 = vrot.slane %v2579_v31, 1 }
  0xcf   : > { %v1053_v11 = vmul.f32 %v1052_v8, %v1046_v39  ;;  %v1068_v16 = vsel %vm1067_vm3, %v1043_v36, %v1066_v10  ;;  %v981_v36 = vld [vmem:[%s2521_s22] sm:$0x7]  ;;  %s2062_s22 = sld [smem:[#allocation3 + $0x1]] }
  0xd0   : > { %v1071_v26 = vsel %vm1069_vm6, %v1070_v21, %v1068_v16  ;;  %v1001_v42 = vsel %vm1000_vm0, %v981_v36, %v990_v37 }
  0xd1   : > { %v1055_v15 = vsel %vm1054_vm4, %v1046_v39, %v1053_v11  ;;  %v2612_v19 = vpop.permute.xlu1 %848  ;;  %v1072_v32 = vmax.f32 %v1071_v26, 1e-16  ;;  %v994_v45 = vpop.permute.xlu0 %993 }
  0xd2   : > { %v2614_v20 = vsel %vm1056_vm5, %v1057_v12, %v1055_v15  ;;  %v853_v24 = vadd.f32 %v2612_v19, %v835_v14  ;;  %v1003_v50 = vsel %vm1002_vm1, %v1001_v42, %v994_v45  ;;  %v738_v15 = vld [vmem:[%s3342_s2 + $0x8] sm:$0xff]  ;;  %s3304_s2 = smov 80  }
  0xd3   : > { %v1059_v25 = vmax.f32 %v2614_v20, 1e-16  ;;  %v2641_v40 = vrot.slane %v1072_v32, 6 }
  0xd4   : > { %v2620_v29 = vmax.f32 %v853_v24, 0.0 }
  0xd5   : > { %v2624_v30 = vrot.slane %v1059_v25, 6  ;;  %v1113_v37 = vand.u32 2147483648, %v2641_v40  ;;  %vm1107_vm13 = vweird.f32 %v2641_v40  ;;  %v1111_v42 = vand.u32 2147483647, %v2641_v40 }
  0xd6   : > { %1229 = vrot.lane.b32.xlu0 %v2620_v29, %s3308_s16  ;;  %1220 = vrot.lane.b32.xlu2 %v2620_v29, %s3310_s28 }
  0xd7   : > { %2195 = vrcp.f32 %v2624_v30  ;;  %877 = vmatpush.msra.mxu0 %v2620_v29  ;;  %2085 = vmatpush.msra.mxu1 %v2620_v29  ;;  %vm1081_vm9 = vweird.f32 %v2624_v30  ;;  %vm1112_vm15 = vcmp.eq.f32.partialorder %v1111_v42, 8.507059e+37  ;;  %v740_v42 = vld [vmem:[%s3345_s5 + $0x8] sm:$0xff] }
  0xd8   : > { %2088 = vmatpush.msra.mxu2 %v2620_v29  ;;  %2197 = vrcp.f32 %v2641_v40 }
  0xd9   : > { %878 = vmatpush.msra.mxu0 %v2604_v3  ;;  %2086 = vmatpush.msra.mxu1 %v2604_v3  ;;  %v2636_v35 = vpop.permute.xlu1 %838 }
  0xda   : > { %2089 = vmatpush.msra.mxu2 %v2604_v3  ;;  %v851_v39 = vadd.f32 %v2636_v35, %v833_v33  ;;  %v1094_v33 = vadd.f32 %v1092_v28, %v2579_v31 }
  0xdc   : > { %v2643_v41 = vmax.f32 %v851_v39, 0.0  ;;  %v1096_v39 = vrot.slane %v1094_v33, 6 }
  0xdd   : > { %v2646_v46 = vpop.eup %2195 }
  0xde   : > { %1238 = vrot.lane.b32.xlu2 %v2620_v29, %s3306_s3  ;;  %1227 = vrot.lane.b32.xlu0 %v2604_v3, %s3308_s16  ;;  %v1077_v49 = vmul.f32 %v2646_v46, %v2624_v30  ;;  %v2676_v60 = vpop.eup %2197  ;;  %vm1082_vm8 = vweird.f32 %v2646_v46 }
  0xdf   : > { %1216 = vrot.lane.b32.xlu1 %v2643_v41, %s3310_s28  ;;  %879 = vmatpush.msra.mxu0 %v2643_v41  ;;  %vm1083_vm10 = vmor %vm1081_vm9, %vm1082_vm8  ;;  %vm1108_vm12 = vweird.f32 %v2676_v60  ;;  %vm1163_vm8 = vcmask 1040384   ;;  %vm1165_vm9 = vcmask 1041408  }
  0xe0   : > { %2087 = vmatpush.msra.mxu1 %v2643_v41  ;;  %2090 = vmatpush.msra.mxu2 %v2643_v41  ;;  %v1078_v55 = vsub.f32 1.0, %v1077_v49  ;;  %vm1109_vm14 = vmor %vm1107_vm13, %vm1108_vm12  ;;  %v1121_v49 = vstv %s2062_s22  ;;  %s2939_s22 = scalar_lea.vmem [#allocation7], %s2037_s27 }
  0xe1   : > { %2045 = vmatmul.msk.f32.vlgmr.msra.gmra.mxu1 %vm857_vm7, %v746_v47  ;;  %v998_v51 = vpop.permute.xlu1 %997  ;;  %2044 = vmatmul.msk.f32.vlgmr.msra.gmra.mxu0 %vm857_vm7, %v745_v48  ;;  %v1114_v47 = vor.u32 1.1754944e-38, %v1113_v37 }
  0xe2   : > { %906 = vmatpush.msrb.mxu1 %v2620_v29  ;;  %v1005_v54 = vsel %vm1004_vm2, %v1003_v50, %v998_v51  ;;  %2049 = vmatmul.msk.f32.vlgmr.msra.gmra.mxu2 %vm857_vm7, %v764_v53  ;;  %v1079_v7 = vmul.f32 %v2646_v46, %v1078_v55  ;;  %v1118_v51 = vstv %s1117_s30  ;;  %v1128_v55 = vstv %s1127_s18  ;;  %s3347_s30 = smov 16   ;;  %s3348_s18 = smov 32  }
  0xe3   : > { %v1189_v56 = vperm.slane %v1005_v54, 0  ;;  %v1193_v57 = vperm.slane %v1005_v54, 1  ;;  %v1200_v59 = vperm.slane %v1005_v54, 2 }
  0xe4   : > { %907 = vmatpush.msrb.mxu1 %v2604_v3  ;;  %v1080_v13 = vadd.f32 %v2646_v46, %v1079_v7 }
  0xe5   : > { %v1190_v61 = vmul.f32 %v1189_v56, %v2597_v58  ;;  %v1191_v63 = vmul.f32 %v1189_v56, %v2568_v18  ;;  %v1192_v2 = vmul.f32 %v1189_v56, %v2588_v43  ;;  %v1194_v4 = vmul.f32 %v1193_v57, %v2602_v62  ;;  %v751_v18 = vld [vmem:[%s3280_s11] sm:$0xff]  ;;  %v765_v43 = vld [vmem:[%s3283_s14 + $0x10] sm:$0xff] }
  0xe6   : > { %v1195_v5 = vmul.f32 %v1193_v57, %v2590_v44  ;;  %v1196_v6 = vmul.f32 %v1193_v57, %v2583_v34  ;;  %908 = vmatpush.msrb.mxu1 %v2643_v41  ;;  %1236 = vrot.lane.b32.xlu2 %v2604_v3, %s3306_s3  ;;  %v1103_v34 = vmul.f32 %v2676_v60, %v2641_v40 }
  0xe7   : > { %1225 = vrot.lane.b32.xlu0 %v2643_v41, %s3308_s16  ;;  %1234 = vrot.lane.b32.xlu1 %v2643_v41, %s3306_s3  ;;  %v1203_v58 = vmul.f32 %v1200_v59, %v2572_v23  ;;  %v1201_v62 = vmul.f32 %v1200_v59, %v2610_v17  ;;  %v1202_v8 = vmul.f32 %v1200_v59, %v2586_v38  ;;  %v1087_v38 = vand.u32 2147483648, %v2624_v30 }
  0xe8   : > { %953 = vmatpush.msra.mxu1 %v2620_v29  ;;  %v1199_v44 = vadd.f32 %v1196_v6, %v1192_v2  ;;  %v1198_v10 = vadd.f32 %v1195_v5, %v1191_v63  ;;  %v1197_v11 = vadd.f32 %v1194_v4, %v1190_v61  ;;  %v1085_v17 = vand.u32 2147483647, %v2624_v30  ;;  %v742_v2 = vld [vmem:[%s3344_s6 + $0x8] sm:$0xff]  ;;  %v741_v4 = vld [vmem:[%s3344_s6] sm:$0xff]  ;;  %s1820_s6 = scalar_lea.sflag [#allocation4], %s2921_s21 }
  0xe9   : > { %2046 = vmatmul.msk.f32.vlgmr.msrb.gmra.mxu1 %vm857_vm7, %v751_v18  ;;  %v1104_v21 = vsub.f32 1.0, %v1103_v34  ;;  %v1084_v27 = vsel %vm1083_vm10, %v2646_v46, %v1080_v13  ;;  %v1088_v30 = vor.u32 1.1754944e-38, %v1087_v38  ;;  %vm1167_vm10 = vcmask 1042432  }
  0xea   : > { %954 = vmatpush.msra.mxu1 %v2604_v3  ;;  %2050 = vmatmul.msk.f32.gmra.mxu2 %vm857_vm7, %v765_v43  ;;  %v1206_v12 = vadd.f32 %v1203_v58, %v1199_v44  ;;  %v1205_v23 = vadd.f32 %v1202_v8, %v1198_v10  ;;  %v1204_v14 = vadd.f32 %v1201_v62, %v1197_v11  ;;  %vm1086_vm11 = vcmp.eq.f32.partialorder %v1085_v17, 8.507059e+37 }
  0xeb   : > { %v1089_v32 = vsel %vm1086_vm11, %v1088_v30, %v1084_v27  ;;  %vm1169_vm11 = vcmask 125952  }
  0xec   : > { %955 = vmatpush.msra.mxu1 %v2643_v41  ;;  %v2716_v16 = vadd.f32 %v1206_v12, %v2612_v19  ;;  %v2723_v24 = vadd.f32 %v1205_v23, %v2595_v52  ;;  %v2726_v26 = vadd.f32 %v1204_v14, %v2636_v35  ;;  %v752_v19 = vld [vmem:[%s3280_s11 + $0x8] sm:$0xff]  ;;  %v1105_v52 = vmul.f32 %v2676_v60, %v1104_v21 }
  0xed   : > { %v1090_v35 = vmul.f32 %v1089_v32, %v2579_v31 }
  0xee   : > { %1423 = vperm.xlu2 %2183, %v738_v15   ;;  %v1106_v36 = vadd.f32 %v2676_v60, %v1105_v52  ;;  %v1212_v8 = vmax.f32 %v2716_v16, 0.0  ;;  %v1210_v30 = vmax.f32 %v2726_v26, 0.0 }
  0xef   : > { %1434 = vperm.xlu0 %2184, %v738_v15   ;;  %1418 = vperm.xlu1 %2182, %v737_v22   ;;  %v1098_v45 = vmul.f32 %v1096_v39, %v1090_v35  ;;  %v739_v39 = vld [vmem:[%s3345_s5] sm:$0xff] }
  0xf0   : > { %v1110_v46 = vsel %vm1109_vm14, %v2676_v60, %v1106_v36 }
  0xf1   : > { %2047 = vmatmul.msk.f32.gmra.mxu1 %vm857_vm7, %v752_v19  ;;  %v1115_v48 = vsel %vm1112_vm15, %v1114_v47, %v1110_v46  ;;  %v747_v46 = vld [vmem:[%s3278_s9] sm:$0xff] }
  0xf2   : > { %v2746_v50 = vmul.f32 %v1115_v48, %v1098_v45  ;;  %v753_v48 = vld [vmem:[%s3281_s12] sm:$0xff] }
  0xf4   : > { %v1119_v40 = vmul.f32 %v1118_v51, %v2746_v50  ;;  %v754_v51 = vld [vmem:[%s3281_s12 + $0x8] sm:$0xff] }
  0xf6   : > { %2185 = vset.pattern.permute.xlu2 %v2335_v0  ;;  %v1122_v0 = vmul.f32 %v1121_v49, %v1059_v25 }
  0xf7   : > { %2186 = vset.pattern.permute.xlu1 %v2340_v9  ;;  %1430 = vperm.xlu2 %2185, %v737_v22  }
  0xf8   : > { %1447 = vperm.xlu1 %2186, %v738_v15   ;;  %2188 = vset.pattern.permute.xlu0 %v2336_v1  ;;  %v1124_v53 = vrot.slane %v1122_v0, 6  ;;  %v1211_v15 = vmax.f32 %v2723_v24, 0.0 }
  0xf9   : > { %1493 = vperm.xlu0 %2188, %v742_v2  }
  0xfa   : > { %v1126_v54 = vadd.f32 %v1124_v53, %v1119_v40  ;;  %v1181_v53 = vrot.slane %v2746_v50, 7 }
  0xfc   : > { %v1129_v56 = vadd.f32 %v1128_v55, %v1126_v54  ;;  %v1174_v54 = vrot.slane %v2746_v50, 1 }
  0xfe   : > { %v1130_v57 = vsub.f32 0.0, %v1129_v56 }
  0xff   : > { %2187 = vset.pattern.permute.xlu2 %v2340_v9 }
 0x100   : > { %1443 = vperm.xlu2 %2187, %v737_v22   ;;  %2189 = vset.pattern.permute.xlu1 %v2336_v1  ;;  %v1131_v59 = vmul.f32 1.442695, %v1130_v57  ;;  %v773_v57 = vld [vmem:[%s3284_s15 + $0x10] sm:$0xff] }
 0x101   : > { %1488 = vperm.xlu1 %2189, %v741_v4  }
 0x102   : > { %2199 = vpow2.f32 %v1131_v59  ;;  %v771_v59 = vld [vmem:[%s3284_s15] sm:$0xff] }
 0x108   : > { %2190 = vset.pattern.permute.xlu2 %v2336_v1  ;;  %v2200_v60 = vpop.eup %2199 }
 0x109   : > { %v1133_v61 = vadd.f32 1.0, %v2200_v60 }
 0x10b   : > { %2201 = vrcp.f32 %v1133_v61  ;;  %v1145_v5 = vand.u32 2147483648, %v1133_v61  ;;  %vm1139_vm4 = vweird.f32 %v1133_v61  ;;  %v1143_v6 = vand.u32 2147483647, %v1133_v61 }
 0x10d   : > { %v1146_v18 = vor.u32 1.1754944e-38, %v1145_v5  ;;  %vm1144_vm6 = vcmp.eq.f32.partialorder %v1143_v6, 8.507059e+37 }
 0x111   : > { %v2202_v20 = vpop.eup %2201 }
 0x112   : > { %v1135_v25 = vmul.f32 %v2202_v20, %v1133_v61  ;;  %vm1140_vm3 = vweird.f32 %v2202_v20  ;;  %v776_v61 = vld [vmem:[%s3284_s15 + $0x28] sm:$0xff] }
 0x113   : > { %vm1141_vm5 = vmor %vm1139_vm4, %vm1140_vm3 }
 0x114   : > { %v1136_v9 = vsub.f32 1.0, %v1135_v25 }
 0x116   : > { %v1137_v63 = vmul.f32 %v2202_v20, %v1136_v9  ;;  %v777_v9 = vld [vmem:[%s3284_s15 + $0x30] sm:$0xff] }
 0x118   : > { %v1138_v1 = vadd.f32 %v2202_v20, %v1137_v63 }
 0x11a   : > { %v1142_v7 = vsel %vm1141_vm5, %v2202_v20, %v1138_v1  ;;  %v774_v20 = vld [vmem:[%s3284_s15 + $0x18] sm:$0xff] }
 0x11b   : > { %v2760_v34 = vsel %vm1144_vm6, %v1146_v18, %v1142_v7 }
 0x11c   : > { %v1252_v44 = vadd.f32 1.0, %v2760_v34  ;;  %v1159_v49 = vrot.slane %v2760_v34, 7  ;;  %v1152_v0 = vrot.slane %v2760_v34, 1 }
 0x11e   : > { %v1253_v58 = vperm.slane %v1252_v44, 2 }
 0x120   : > { %v1256_v23 = vmul.f32 %v1253_v58, %v1212_v8 }
 0x130   : > { %v1221_v43 = vpop.permute.xlu2 %1220 }
 0x131   : > { %v1245_v10 = vsel %vm1000_vm0, %v2620_v29, %v1221_v43  ;;  %v1255_v29 = vmul.f32 %v1253_v58, %v1211_v15  ;;  %v1437_v15 = vperm.slane %v2579_v31, 1 }
 0x138   : > { %v1239_v62 = vpop.permute.xlu2 %1238 }
 0x13d   : > { %v1219_v12 = vpop.permute.xlu1 %1218 }
 0x13e   : > { %v1244_v17 = vsel %vm1000_vm0, %v2604_v3, %v1219_v12  ;;  %v1254_v3 = vmul.f32 %v1253_v58, %v1210_v30 }
 0x140   : > { %v1237_v22 = vpop.permute.xlu2 %1236 }
 0x148   : > { %v1230_v11 = vpop.permute.xlu0 %1229  ;;  %v1424_v56 = vpop.permute.xlu2 %1423 }
 0x149   : > { %v1248_v13 = vsel %vm1002_vm1, %v1245_v10, %v1230_v11 }
 0x14a   : > { %v1251_v14 = vsel %vm1004_vm2, %v1248_v13, %v1239_v62 }
 0x14b   : > { %v1259_v38 = vsub.f32 %v1256_v23, %v1251_v14  ;;  %v766_v23 = vld [vmem:[%s3283_s14 + $0x18] sm:$0xff]  ;;  %v1426_v14 = vperm.slane %v2579_v31, 0 }
 0x14c   : > { %2051 = vmatmul.msk.f32.gmra.mxu2 %vm857_vm7, %v766_v23 }
 0x14d   : > { %1474 = vmatpush.msra.mxu3 %v1259_v38 }
 0x150   : > { %v1228_v21 = vpop.permute.xlu0 %1227 }
 0x151   : > { %v1247_v16 = vsel %vm1002_vm1, %v1244_v17, %v1228_v21  ;;  %v1217_v27 = vpop.permute.xlu1 %1216  ;;  %v1431_v60 = vpop.permute.xlu2 %1430 }
 0x152   : > { %v1250_v28 = vsel %vm1004_vm2, %v1247_v16, %v1237_v22  ;;  %v1243_v52 = vsel %vm1000_vm0, %v2643_v41, %v1217_v27  ;;  %v748_v41 = vld [vmem:[%s3278_s9 + $0x8] sm:$0xff]  ;;  %v1438_v16 = vmul.f32 %v1437_v15, %v1431_v60  ;;  %v1150_v60 = vrot.slane %v2760_v34, 2 }
 0x153   : > { %v1258_v19 = vsub.f32 %v1255_v29, %v1250_v28  ;;  %v1450_v29 = vperm.slane %v2579_v31, 2 }
 0x155   : > { %1475 = vmatpush.msra.mxu3 %v1258_v19 }
 0x159   : > { %v1226_v32 = vpop.permute.xlu0 %1225  ;;  %v1235_v24 = vpop.permute.xlu1 %1234 }
 0x15a   : > { %v1246_v33 = vsel %vm1002_vm1, %v1243_v52, %v1226_v32  ;;  %v1444_v25 = vpop.permute.xlu2 %1443  ;;  %v1428_v52 = vmul.f32 %v1426_v14, %v1424_v56 }
 0x15b   : > { %v1249_v35 = vsel %vm1004_vm2, %v1246_v33, %v1235_v24  ;;  %v1451_v32 = vmul.f32 %v1450_v29, %v1444_v25 }
 0x15c   : > { %v1257_v36 = vsub.f32 %v1254_v3, %v1249_v35 }
 0x15e   : > { %v2778_v37 = vpop.f32.mrf.mxu1  ;;  %1476 = vmatpush.msra.mxu3 %v1257_v36  ;;  %v2793_v26 = vpop.f32.mrf.mxu0 }
 0x15f   : > { %1276 = vrot.lane.b32.xlu0 %v2778_v37, %s3306_s3  ;;  %1270 = vrot.lane.b32.xlu1 %v2778_v37, %s3308_s16 }
 0x160   : > { %1264 = vrot.lane.b32.xlu2 %v2778_v37, %s3310_s28  ;;  %2063 = vmatmul.msk.f32.vlgmr.msra.gmra.mxu3 %vm857_vm7, %v739_v39 }
 0x161   : > { %v1419_v63 = vpop.permute.xlu1 %1418  ;;  %v1435_v4 = vpop.permute.xlu0 %1434 }
 0x162   : > { %v1427_v17 = vmul.f32 %v1426_v14, %v1419_v63  ;;  %v1439_v28 = vmul.f32 %v1437_v15, %v1435_v4 }
 0x164   : > { %v1440_v19 = vadd.f32 %v1438_v16, %v1427_v17  ;;  %v1441_v35 = vadd.f32 %v1439_v28, %v1428_v52 }
 0x165   : > { %v2834_v40 = vpop.f32.mrf.mxu2 }
 0x166   : > { %v2803_v45 = vpop.f32.mrf.mxu1  ;;  %v1453_v36 = vadd.f32 %v1451_v32, %v1440_v19 }
 0x167   : > { %1536 = vperm.xlu0 %2188, %v748_v41   ;;  %1268 = vrot.lane.b32.xlu1 %v2793_v26, %s3308_s16  ;;  %v763_v41 = vld [vmem:[%s3283_s14] sm:$0xff] }
 0x168   : > { %1262 = vrot.lane.b32.xlu2 %v2793_v26, %s3310_s28  ;;  %2064 = vmatmul.msk.f32.gmra.mxu3 %vm857_vm7, %v740_v42 }
 0x169   : > { %2048 = vmatmul.msk.f32.vlgmr.msra.gmra.mxu1 %vm857_vm7, %v763_v41 }
 0x16a   : > { %v1448_v1 = vpop.permute.xlu1 %1447 }
 0x16b   : > { %v1494_v6 = vpop.permute.xlu0 %1493  ;;  %v1452_v24 = vmul.f32 %v1450_v29, %v1448_v1 }
 0x16d   : > { %v2842_v55 = vpop.f32.mrf.mxu2  ;;  %v1454_v42 = vadd.f32 %v1452_v24, %v1441_v35 }
 0x16e   : > { %v2812_v47 = vpop.f32.mrf.mxu1 }
 0x16f   : > { %1294 = vrot.lane.b32.xlu0 %v2803_v45, %s3308_s16  ;;  %1531 = vperm.xlu1 %2189, %v747_v46  }
 0x170   : > { %1274 = vrot.lane.b32.xlu2 %v2793_v26, %s3306_s3 }
 0x173   : > { %v1489_v7 = vpop.permute.xlu1 %1488 }
 0x177   : > { %1296 = vrot.lane.b32.xlu0 %v2812_v47, %s3308_s16  ;;  %1288 = vrot.lane.b32.xlu1 %v2803_v45, %s3310_s28 }
 0x178   : > { %1290 = vrot.lane.b32.xlu2 %v2812_v47, %s3310_s28 }
 0x17f   : > { %1574 = vperm.xlu0 %2188, %v753_v48   ;;  %1300 = vrot.lane.b32.xlu1 %v2803_v45, %s3306_s3 }
 0x180   : > { %1302 = vrot.lane.b32.xlu2 %v2812_v47, %s3306_s3 }
 0x187   : > { %1160 = vrot.lane.b32.xlu0 %v1159_v49, %s3304_s2  ;;  %1153 = vrot.lane.b32.xlu1 %v1152_v0, %s3300_s26 }
 0x188   : > { %1579 = vperm.xlu2 %2190, %v754_v51  }
 0x18f   : > { %1182 = vrot.lane.b32.xlu0 %v1181_v53, %s3304_s2  ;;  %1175 = vrot.lane.b32.xlu1 %v1174_v54, %s3300_s26  ;;  %s3349_s2 = smov 48  }
 0x190   : > { %1156 = vrot.lane.b32.xlu2 %v2760_v34, %s3302_s23  ;;  %v1172_v34 = vrot.slane %v2746_v50, 2 }
 0x197   : > { %1324 = vrot.lane.b32.xlu0 %v2842_v55, %s3310_s28  ;;  %1346 = vrot.lane.b32.xlu1 %v2834_v40, %s3308_s16 }
 0x198   : > { %1178 = vrot.lane.b32.xlu2 %v2746_v50, %s3302_s23  ;;  %s2932_s23 = scalar_lea.vmem [#allocation6], %s2037_s27  ;;  %v768_v50 = vld [vmem:[%s3283_s14 + $0x28] sm:$0xff]  ;;  %s3352_s27 = smov 112  }
 0x199   : > { %s1841_s4 = sshll.u32 %s2932_s23, 4  ;;  %s1842_s4 = int_to_ptr.vmem [resolvable:$true] %s1841_s4 }
 0x19f   : > { %1370 = vrot.lane.b32.xlu0 %v2834_v40, %s3306_s3  ;;  %1372 = vrot.lane.b32.xlu1 %v2842_v55, %s3306_s3 }
 0x1a0   : > { %1322 = vrot.lane.b32.xlu2 %v2834_v40, %s3310_s28 }
 0x1a7   : > { %1663 = vperm.xlu0 %2188, %v773_v57   ;;  %1653 = vperm.xlu1 %2189, %v771_v59   ;;  %v743_v57 = vld [vmem:[%s3346_s7] sm:$0xff] }
 0x1a8   : > { %1348 = vrot.lane.b32.xlu2 %v2842_v55, %s3308_s16 }
 0x1af   : > { %1678 = vperm.xlu0 %2188, %v776_v61   ;;  %1668 = vperm.xlu1 %2189, %v774_v20  }
 0x1b7   : > { %1683 = vperm.xlu1 %2189, %v777_v9   ;;  %v744_v9 = vld [vmem:[%s3346_s7 + $0x8] sm:$0xff] }
 0x1ba   : > { %v1265_v2 = vpop.permute.xlu2 %1264 }
 0x1bb   : > { %v1281_v18 = vsel %vm1000_vm0, %v2778_v37, %v1265_v2 }
 0x1c2   : > { %v1263_v5 = vpop.permute.xlu2 %1262 }
 0x1c3   : > { %v1280_v8 = vsel %vm1000_vm0, %v2793_v26, %v1263_v5 }
 0x1ca   : > { %v1275_v43 = vpop.permute.xlu2 %1274 }
 0x1d1   : > { %v1277_v44 = vpop.permute.xlu0 %1276  ;;  %v1271_v58 = vpop.permute.xlu1 %1270 }
 0x1d2   : > { %v1283_v62 = vsel %vm1002_vm1, %v1281_v18, %v1271_v58  ;;  %v1291_v12 = vpop.permute.xlu2 %1290  ;;  %v770_v58 = vld [vmem:[%s3283_s14 + $0x38] sm:$0xf] }
 0x1d3   : > { %v2887_v38 = vsel %vm1004_vm2, %v1283_v62, %v1277_v44  ;;  %v1307_v33 = vsel %vm1000_vm0, %v2812_v47, %v1291_v12  ;;  %v769_v44 = vld [vmem:[%s3283_s14 + $0x30] sm:$0xff]  ;;  %v2959_v62 = vpop.f32.mrf.mxu2  ;;  %v775_v12 = vld [vmem:[%s3284_s15 + $0x20] sm:$0xff] }
 0x1d4   : > { %1326 = vrot.lane.b32.xlu1 %v2959_v62, %s3347_s30  ;;  %1350 = vrot.lane.b32.xlu0 %v2959_v62, %s3348_s18 }
 0x1d9   : > { %v2878_v10 = vpop.permute.xlu0 %1536  ;;  %v1269_v11 = vpop.permute.xlu1 %1268 }
 0x1da   : > { %v1282_v13 = vsel %vm1002_vm1, %v1280_v8, %v1269_v11  ;;  %v2895_v30 = vpop.permute.xlu2 %1302  ;;  %v772_v8 = vld [vmem:[%s3284_s15 + $0x8] sm:$0xff] }
 0x1db   : > { %v2900_v3 = vsel %vm1004_vm2, %v1282_v13, %v1275_v43  ;;  %v767_v43 = vld [vmem:[%s3283_s14 + $0x20] sm:$0xff]  ;;  %1658 = vperm.xlu2 %2190, %v772_v8   ;;  %v778_v13 = vld [vmem:[%s3284_s15 + $0x38] sm:$0xf] }
 0x1dc   : > { %2052 = vmatmul.msk.f32.gmra.mxu2 %vm857_vm7, %v767_v43 }
 0x1e1   : > { %v2890_v21 = vpop.permute.xlu0 %1294  ;;  %v2892_v22 = vpop.permute.xlu1 %1531 }
 0x1e2   : > { %v2911_v48 = vpop.permute.xlu2 %1579 }
 0x1e3   : > { %v1478_v27 = vpop.f32.mrf.mxu3  ;;  %1673 = vperm.xlu2 %2190, %v775_v12  }
 0x1e4   : > { %v1484_v26 = vadd.f32 %v1478_v27, %v1453_v36  ;;  %2053 = vmatmul.msk.f32.gmra.mxu2 %vm857_vm7, %v768_v50 }
 0x1e6   : > { %v1496_v49 = vadd.f32 %v1489_v7, %v1484_v26  ;;  %v2968_v11 = vpop.f32.mrf.mxu1 }
 0x1e7   : > { %1320 = vrot.lane.b32.xlu1 %v2968_v11, %s3347_s30  ;;  %1344 = vrot.lane.b32.xlu0 %v2968_v11, %s3348_s18 }
 0x1e8   : > { %v1498_v56 = vmax.f32 %v1496_v49, 0.0 }
 0x1e9   : > { %v1297_v37 = vpop.permute.xlu0 %1296  ;;  %v2905_v31 = vpop.permute.xlu1 %1288 }
 0x1ea   : > { %v2903_v39 = vsel %vm1002_vm1, %v1307_v33, %v1297_v37  ;;  %v1157_v59 = vpop.permute.xlu2 %1156  ;;  %v1306_v36 = vsel %vm1000_vm0, %v2803_v45, %v2905_v31  ;;  %v758_v31 = vld [vmem:[%s3282_s13 + $0x18] sm:$0xff] }
 0x1eb   : > { %v1481_v46 = vpop.f32.mrf.mxu3  ;;  %1688 = vperm.xlu2 %2190, %v778_v13   ;;  %v1308_v41 = vsel %vm1002_vm1, %v1306_v36, %v2890_v21  ;;  %v755_v21 = vld [vmem:[%s3282_s13] sm:$0xff] }
 0x1ec   : > { %v1485_v47 = vadd.f32 %v1481_v46, %v1454_v42  ;;  %2054 = vmatmul.msk.f32.gmra.mxu2 %vm857_vm7, %v769_v44  ;;  %v1311_v46 = vsel %vm1004_vm2, %v2903_v39, %v2895_v30  ;;  %v756_v30 = vld [vmem:[%s3282_s13 + $0x8] sm:$0xff]  ;;  %v759_v39 = vld [vmem:[%s3282_s13 + $0x20] sm:$0xff] }
 0x1ee   : > { %v1497_v51 = vadd.f32 %v1494_v6, %v1485_v47 }
 0x1f0   : > { %v1499_v0 = vmax.f32 %v1497_v51, 0.0 }
 0x1f1   : > { %v2913_v53 = vpop.permute.xlu0 %1574  ;;  %v2915_v54 = vpop.permute.xlu1 %1300 }
 0x1f2   : > { %1520 = vmatpush.msrb.mxu0 %v1499_v0  ;;  %1561 = vmatpush.msrb.mxu1 %v1499_v0  ;;  %v1179_v1 = vpop.permute.xlu2 %1178  ;;  %v1310_v26 = vsel %vm1004_vm2, %v1308_v41, %v2915_v54  ;;  %v761_v54 = vld [vmem:[%s3282_s13 + $0x30] sm:$0xff] }
 0x1f3   : > { %2091 = vmatpush.msrb.mxu3 %v1499_v0  ;;  %1374 = vrot.lane.b32.xlu2 %v2959_v62, %s3349_s2 }
 0x1f4   : > { %1521 = vmatpush.msrb.mxu0 %v1498_v56  ;;  %1562 = vmatpush.msrb.mxu1 %v1498_v56 }
 0x1f5   : > { %2092 = vmatpush.msrb.mxu3 %v1498_v56  ;;  %2065 = vmatmul.msk.f32.vlgmr.msrb.gmra.mxu0 %vm1000_vm0, %v743_v57  ;;  %v762_v57 = vld [vmem:[%s3282_s13 + $0x38] sm:$0xf] }
 0x1f6   : > { %1620 = vmatpush.msra.mxu0 %v1499_v0  ;;  %2055 = vmatmul.msk.f32.gmra.mxu2 %vm857_vm7, %v770_v58 }
 0x1f8   : > { %1621 = vmatpush.msra.mxu0 %v1498_v56 }
 0x1f9   : > { %v1161_v61 = vpop.permute.xlu0 %1160  ;;  %v1154_v20 = vpop.permute.xlu1 %1153 }
 0x1fa   : > { %v1164_v25 = vsel %vm1163_vm8, %v1150_v60, %v1154_v20  ;;  %v2980_v14 = vpop.permute.xlu2 %1322 }
 0x1fb   : > { %v1166_v63 = vsel %vm1165_vm9, %v1164_v25, %v1157_v59  ;;  %1368 = vrot.lane.b32.xlu2 %v2968_v11, %s3349_s2 }
 0x1fc   : > { %v1168_v2 = vsel %vm1167_vm10, %v1166_v63, %v1161_v61 }
 0x1fd   : > { %2066 = vmatmul.msk.f32.gmra.mxu0 %vm1000_vm0, %v744_v9  ;;  %1170 = vst.msk [vmem:[%s2932_s23] sm:$0xf] %vm1169_vm11, %v1168_v2 }
 0x201   : > { %v1176_v4 = vpop.permute.xlu1 %1175  ;;  %v1183_v6 = vpop.permute.xlu0 %1182 }
 0x202   : > { %v1185_v5 = vsel %vm1163_vm8, %v1172_v34, %v1176_v4  ;;  %v1349_v52 = vpop.permute.xlu2 %1348 }
 0x203   : > { %v1186_v7 = vsel %vm1165_vm9, %v1185_v5, %v1179_v1 }
 0x204   : > { %v1187_v18 = vsel %vm1167_vm10, %v1186_v7, %v1183_v6 }
 0x205   : > { %1188 = vst.msk [vmem:[%s2939_s22] sm:$0xf] %vm1169_vm11, %v1187_v18 }
 0x209   : > { %v1325_v16 = vpop.permute.xlu0 %1324  ;;  %v1347_v59 = vpop.permute.xlu1 %1346 }
 0x20a   : > { %v1394_v29 = vsel %vm1000_vm0, %v2842_v55, %v1325_v16  ;;  %v750_v55 = vld [vmem:[%s3279_s10 + $0x8] sm:$0xff] }
 0x20b   : > { %v2991_v24 = vsel %vm1002_vm1, %v1394_v29, %v1349_v52  ;;  %v1393_v29 = vsel %vm1000_vm0, %v2834_v40, %v2980_v14 }
 0x20c   : > { %v1401_v52 = vsel %vm1002_vm1, %v1393_v29, %v1347_v59 }
 0x211   : > { %v1373_v60 = vpop.permute.xlu1 %1372  ;;  %v1371_v20 = vpop.permute.xlu0 %1370 }
 0x219   : > { %v1654_v61 = vpop.permute.xlu1 %1653  ;;  %v3079_v63 = vpop.permute.xlu0 %1663 }
 0x221   : > { %v1669_v9 = vpop.permute.xlu1 %1668  ;;  %v3083_v4 = vpop.permute.xlu0 %1678 }
 0x229   : > { %v3081_v34 = vpop.permute.xlu1 %1683 }
 0x235   : > { %v1659_v25 = vpop.permute.xlu2 %1658 }
 0x23d   : > { %v1674_v2 = vpop.permute.xlu2 %1673 }
 0x245   : > { %v3085_v1 = vpop.permute.xlu2 %1688 }
 0x246   : > { %v1327_v5 = vpop.permute.xlu1 %1326  ;;  %v1351_v6 = vpop.permute.xlu0 %1350 }
 0x247   : > { %v1395_v8 = vsel %vm1000_vm0, %v2959_v62, %v1327_v5 }
 0x24d   : > { %v1375_v7 = vpop.permute.xlu2 %1374 }
 0x255   : > { %v1369_v58 = vpop.permute.xlu2 %1368 }
 0x259   : > { %v1321_v18 = vpop.permute.xlu1 %1320  ;;  %v1345_v50 = vpop.permute.xlu0 %1344 }
 0x25a   : > { %v1392_v43 = vsel %vm1000_vm0, %v2968_v11, %v1321_v18 }
 0x25b   : > { %v1400_v44 = vsel %vm1002_vm1, %v1392_v43, %v1345_v50 }
 0x25c   : > { %v1408_v12 = vsel %vm1004_vm2, %v1400_v44, %v1369_v58 }
 0x272   : > { %v1523_v23 = vpop.f32.mrf.mxu0 }
 0x273   : > { %v1524_v15 = vadd.f32 %v1523_v23, %v2900_v3  ;;  %v749_v3 = vld [vmem:[%s3279_s10] sm:$0xff] }
 0x275   : > { %v1539_v28 = vadd.f32 %v2892_v22, %v1524_v15  ;;  %v1403_v15 = vsel %vm1002_vm1, %v1395_v8, %v1351_v6 }
 0x276   : > { %v1411_v11 = vsel %vm1004_vm2, %v1403_v15, %v1375_v7 }
 0x277   : > { %v1541_v33 = vmax.f32 %v1539_v28, 0.0 }
 0x27a   : > { %v1526_v17 = vpop.f32.mrf.mxu0 }
 0x27b   : > { %v1527_v27 = vadd.f32 %v1526_v17, %v2887_v38 }
 0x27d   : > { %v1540_v19 = vadd.f32 %v2878_v10, %v1527_v27  ;;  %v3003_v10 = vpop.f32.mrf.mxu2 }
 0x27e   : > { %1376 = vrot.lane.b32.xlu0 %v3003_v10, %s3349_s2  ;;  %1352 = vrot.lane.b32.xlu1 %v3003_v10, %s3348_s18 }
 0x27f   : > { %v1542_v32 = vmax.f32 %v1540_v19, 0.0  ;;  %1328 = vrot.lane.b32.xlu2 %v3003_v10, %s3347_s30 }
 0x281   : > { %1563 = vmatpush.msrb.mxu1 %v1542_v32  ;;  %1622 = vmatpush.msra.mxu0 %v1542_v32 }
 0x282   : > { %2093 = vmatpush.msrb.mxu3 %v1542_v32 }
 0x283   : > { %1564 = vmatpush.msrb.mxu1 %v1541_v33  ;;  %1623 = vmatpush.msra.mxu0 %v1541_v33 }
 0x284   : > { %2094 = vmatpush.msrb.mxu3 %v1541_v33  ;;  %2067 = vmatmul.msk.f32.vlgmr.msrb.gmra.mxu1 %vm1002_vm1, %v749_v3  ;;  %v1409_v3 = vsel %vm1004_vm2, %v1401_v52, %v1371_v20 }
 0x285   : > { %v3011_v38 = vpop.f32.mrf.mxu2 }
 0x286   : > { %1330 = vrot.lane.b32.xlu0 %v3011_v38, %s3347_s30  ;;  %1378 = vrot.lane.b32.xlu1 %v3011_v38, %s3349_s2 }
 0x287   : > { %1354 = vrot.lane.b32.xlu2 %v3011_v38, %s3348_s18 }
 0x28c   : > { %2068 = vmatmul.msk.f32.gmra.mxu1 %vm1002_vm1, %v750_v55 }
 0x28d   : > { %v3019_v22 = vpop.f32.mrf.mxu2 }
 0x28e   : > { %1332 = vrot.lane.b32.xlu1 %v3019_v22, %s3347_s30  ;;  %1356 = vrot.lane.b32.xlu0 %v3019_v22, %s3348_s18 }
 0x28f   : > { %1380 = vrot.lane.b32.xlu2 %v3019_v22, %s3349_s2 }
 0x295   : > { %v3027_v35 = vpop.f32.mrf.mxu2 }
 0x296   : > { %1358 = vrot.lane.b32.xlu1 %v3027_v35, %s3348_s18  ;;  %1382 = vrot.lane.b32.xlu0 %v3027_v35, %s3349_s2  ;;  %s3351_s18 = smov 96   ;;  %s2079_s2 = sshll.u32 %s2324_s25, 2 }
 0x297   : > { %1334 = vrot.lane.b32.xlu2 %v3027_v35, %s3347_s30  ;;  %s3350_s30 = smov 80   ;;  %s1839_s3 = scalar_lea.hbm %s3288_s19, %s2079_s2 }
 0x298   : > { %s1854_s1 = scalar_lea.hbm %s3289_s20, %s2079_s2  ;;  %s1843_s5 = sshll.u32 %s1839_s3, 4  ;;  %s1844_s5 = int_to_ptr.hbm [resolvable:$true] %s1843_s5 }
 0x299   : > { %s2232_s7 = sshra.s32 %s1844_s5, 4  ;;  %s2233_s7 = int_to_ptr.hbm [resolvable:$true] %s2232_s7 }
 0x29a   : > { %s2234_s8 = scalar_lea.hbm %s2233_s7, 4  ;;  %p2239_p5 = scmp.lt.s32.totalorder %s2233_s7, %s3288_s19 }
 0x29b   : > { %p2235_p1 = scmp.ne.s32.totalorder %s2233_s7, %s2234_s8  ;;  %p2240_p6 = scmp.lt.s32.totalorder %s2238_s0, %s2234_s8 }
 0x29d   : > { %p2236_p2 = pnand %p2235_p1, %p2492_p4  ;;  %p2241_p7 = por %p2240_p6, %p2239_p5 }
 0x29f   : > { %p2237_p3 = pneg %p2236_p2 }
 0x2a1   : > { %p2242_p9 = pnand %p2241_p7, %p2237_p3 }
 0x2d9   : > { %v1329_v16 = vpop.permute.xlu2 %1328 }
 0x2da   : > { %v1396_v14 = vsel %vm1000_vm0, %v3003_v10, %v1329_v16 }
 0x2e1   : > { %v1355_v36 = vpop.permute.xlu2 %1354 }
 0x2f0   : > { %v1353_v28 = vpop.permute.xlu1 %1352  ;;  %v1377_v33 = vpop.permute.xlu0 %1376 }
 0x2f1   : > { %v1404_v41 = vsel %vm1002_vm1, %v1396_v14, %v1353_v28 }
 0x301   : > { %v1566_v37 = vpop.f32.mrf.mxu1 }
 0x302   : > { %v1567_v42 = vadd.f32 %v1566_v37, %v1310_v26  ;;  %v1379_v26 = vpop.permute.xlu1 %1378 }
 0x304   : > { %v1582_v51 = vadd.f32 %v2913_v53, %v1567_v42  ;;  %v760_v53 = vld [vmem:[%s3282_s13 + $0x28] sm:$0xff]  ;;  %v1412_v42 = vsel %vm1004_vm2, %v1404_v41, %v1377_v33 }
 0x306   : > { %v1584_v45 = vmax.f32 %v1582_v51, 0.0 }
 0x309   : > { %v1569_v47 = vpop.f32.mrf.mxu1 }
 0x30a   : > { %v1570_v49 = vadd.f32 %v1569_v47, %v1311_v46  ;;  %v1331_v46 = vpop.permute.xlu0 %1330 }
 0x30c   : > { %v1583_v0 = vadd.f32 %v2911_v48, %v1570_v49  ;;  %v757_v48 = vld [vmem:[%s3282_s13 + $0x10] sm:$0xff]  ;;  %v1381_v49 = vpop.permute.xlu2 %1380 }
 0x30e   : > { %v1585_v56 = vmax.f32 %v1583_v0, 0.0 }
 0x310   : > { %1624 = vmatpush.msra.mxu0 %v1585_v56  ;;  %2095 = vmatpush.msrb.mxu3 %v1585_v56  ;;  %v1333_v56 = vpop.permute.xlu1 %1332 }
 0x312   : > { %1625 = vmatpush.msra.mxu0 %v1584_v45  ;;  %2096 = vmatpush.msrb.mxu3 %v1584_v45  ;;  %v1410_v45 = vsel %vm1004_vm2, %v2991_v24, %v1373_v60 }
 0x313   : > { %2069 = vmatmul.msk.f32.vlgmr.msra.gmra.mxu0 %vm1004_vm2, %v755_v21  ;;  %2072 = vmatmul.msk.f32.vlgmr.msrb.gmra.mxu3 %vm1004_vm2, %v758_v31  ;;  %v1397_v31 = vsel %vm1000_vm0, %v3011_v38, %v1331_v46 }
 0x314   : > { %v1335_v24 = vpop.permute.xlu2 %1334 }
 0x315   : > { %v1399_v60 = vsel %vm1000_vm0, %v3027_v35, %v1335_v24 }
 0x31b   : > { %2070 = vmatmul.msk.f32.gmra.mxu0 %vm1004_vm2, %v756_v30  ;;  %2073 = vmatmul.msk.f32.gmra.mxu3 %vm1004_vm2, %v759_v39  ;;  %v1398_v30 = vsel %vm1000_vm0, %v3019_v22, %v1333_v56  ;;  %v1357_v39 = vpop.permute.xlu0 %1356 }
 0x323   : > { %2071 = vmatmul.msk.f32.gmra.mxu0 %vm1004_vm2, %v757_v48  ;;  %2074 = vmatmul.msk.f32.gmra.mxu3 %vm1004_vm2, %v760_v53  ;;  %v1405_v53 = vsel %vm1002_vm1, %v1397_v31, %v1355_v36 }
 0x324   : > { %v1413_v38 = vsel %vm1004_vm2, %v1405_v53, %v1379_v26 }
 0x32b   : > { %2075 = vmatmul.msk.f32.gmra.mxu3 %vm1004_vm2, %v761_v54 }
 0x333   : > { %2076 = vmatmul.msk.f32.gmra.mxu3 %vm1004_vm2, %v762_v57  ;;  %v1406_v57 = vsel %vm1002_vm1, %v1398_v30, %v1357_v39 }
 0x334   : > { %v1414_v59 = vsel %vm1004_vm2, %v1406_v57, %v1381_v49 }
 0x390   : > { %v1627_v13 = vpop.f32.mrf.mxu0 }
 0x391   : > { %v1628_v23 = vadd.f32 %v1627_v13, %v1408_v12 }
 0x393   : > { %v3094_v17 = vadd.f32 %v1654_v61, %v1628_v23  ;;  %v1359_v61 = vpop.permute.xlu1 %1358 }
 0x395   : > { %1771 = vrot.lane.b32.xlu1 %v3094_v17, %s3350_s30  ;;  %1739 = vrot.lane.b32.xlu2 %v3094_v17, %s3351_s18 }
 0x396   : > { %1707 = vrot.lane.b32.xlu0 %v3094_v17, %s3352_s27  ;;  %v1636_v62 = vpop.f32.mrf.mxu3 }
 0x397   : > { %v1637_v27 = vadd.f32 %v1636_v62, %v1411_v11 }
 0x398   : > { %v1630_v32 = vpop.f32.mrf.mxu0 }
 0x399   : > { %v3106_v19 = vadd.f32 %v1669_v9, %v1637_v27  ;;  %v1631_v40 = vadd.f32 %v1630_v32, %v1409_v3  ;;  %v1383_v9 = vpop.permute.xlu0 %1382 }
 0x39b   : > { %v3118_v37 = vadd.f32 %v1659_v25, %v1631_v40  ;;  %v1407_v25 = vsel %vm1002_vm1, %v1399_v60, %v1359_v61 }
 0x39c   : > { %v1415_v35 = vsel %vm1004_vm2, %v1407_v25, %v1383_v9 }
 0x39d   : > { %1777 = vrot.lane.b32.xlu1 %v3106_v19, %s3350_s30  ;;  %1745 = vrot.lane.b32.xlu2 %v3106_v19, %s3351_s18 }
 0x39e   : > { %1713 = vrot.lane.b32.xlu0 %v3106_v19, %s3352_s27  ;;  %v1639_v55 = vpop.f32.mrf.mxu3 }
 0x39f   : > { %v1640_v47 = vadd.f32 %v1639_v55, %v1412_v42 }
 0x3a0   : > { %v1633_v0 = vpop.f32.mrf.mxu0 }
 0x3a1   : > { %v3128_v51 = vadd.f32 %v1674_v2, %v1640_v47  ;;  %v1634_v21 = vadd.f32 %v1633_v0, %v1410_v45 }
 0x3a3   : > { %v3144_v54 = vadd.f32 %v3079_v63, %v1634_v21 }
 0x3a5   : > { %1709 = vrot.lane.b32.xlu1 %v3118_v37, %s3352_s27  ;;  %1773 = vrot.lane.b32.xlu2 %v3118_v37, %s3350_s30 }
 0x3a6   : > { %1741 = vrot.lane.b32.xlu0 %v3118_v37, %s3351_s18  ;;  %v1642_v10 = vpop.f32.mrf.mxu3 }
 0x3a7   : > { %v1643_v22 = vadd.f32 %v1642_v10, %v1413_v38 }
 0x3a9   : > { %v3159_v63 = vadd.f32 %v3083_v4, %v1643_v22 }
 0x3ad   : > { %1715 = vrot.lane.b32.xlu1 %v3128_v51, %s3352_s27  ;;  %1779 = vrot.lane.b32.xlu2 %v3128_v51, %s3350_s30 }
 0x3ae   : > { %1747 = vrot.lane.b32.xlu0 %v3128_v51, %s3351_s18  ;;  %v1645_v48 = vpop.f32.mrf.mxu3 }
 0x3af   : > { %v1646_v20 = vadd.f32 %v1645_v48, %v1414_v59 }
 0x3b1   : > { %v3162_v2 = vadd.f32 %v3081_v34, %v1646_v20 }
 0x3b5   : > { %1743 = vrot.lane.b32.xlu1 %v3144_v54, %s3351_s18  ;;  %1711 = vrot.lane.b32.xlu2 %v3144_v54, %s3352_s27 }
 0x3b6   : > { %1775 = vrot.lane.b32.xlu0 %v3144_v54, %s3350_s30  ;;  %v1648_v5 = vpop.f32.mrf.mxu3 }
 0x3b7   : > { %v1649_v6 = vadd.f32 %v1648_v5, %v1415_v35 }
 0x3b9   : > { %v3180_v34 = vadd.f32 %v3085_v1, %v1649_v6 }
 0x3bd   : > { %1749 = vrot.lane.b32.xlu1 %v3159_v63, %s3351_s18  ;;  %1717 = vrot.lane.b32.xlu2 %v3159_v63, %s3352_s27 }
 0x3be   : > { %1719 = vrot.lane.b32.xlu0 %v3162_v2, %s3352_s27 }
 0x3bf   : > { %2245 = shalt.err (!%p2242_p9)
}
 0x3c0   : > { %2101 = dma.vmem_to_hbm [thread:$0]  (%p2492_p4), %s1842_s4, 64, %s1844_s5, %s1820_s6  }
 0x3c1   : > { %s1856_s16 = sshll.u32 %s2939_s22, 4  ;;  %s1858_s3 = sshll.u32 %s1854_s1, 4  ;;  %s1857_s16 = int_to_ptr.vmem [resolvable:$true] %s1856_s16  ;;  %s1859_s3 = int_to_ptr.hbm [resolvable:$true] %s1858_s3 }
 0x3c2   : > { %s1825_s7 = scalar_lea.sflag [#allocation8], %s2921_s21  ;;  %s2260_s8 = sshra.s32 %s1859_s3, 4  ;;  %s2261_s8 = int_to_ptr.hbm [resolvable:$true] %s2260_s8 }
 0x3c3   : > { %s2262_s28 = scalar_lea.hbm %s2261_s8, 4  ;;  %s2266_s4 = scalar_lea.hbm %s3289_s20, 8 }
 0x3c4   : > { %p2263_p10 = scmp.ne.s32.totalorder %s2261_s8, %s2262_s28  ;;  %p2267_p13 = scmp.lt.s32.totalorder %s2261_s8, %s3289_s20 }
 0x3c5   : > { %1721 = vrot.lane.b32.xlu1 %v3180_v34, %s3352_s27  ;;  %1751 = vrot.lane.b32.xlu2 %v3162_v2, %s3351_s18  ;;  %p2268_p0 = scmp.lt.s32.totalorder %s2266_s4, %s2262_s28 }
 0x3c6   : > { %1753 = vrot.lane.b32.xlu0 %v3180_v34, %s3351_s18  ;;  %p2264_p11 = pnand %p2263_p10, %p2492_p4 }
 0x3c7   : > { %p2269_p1 = por %p2268_p0, %p2267_p13 }
 0x3c8   : > { %p2265_p12 = pneg %p2264_p11 }
 0x3ca   : > { %p2270_p2 = pnand %p2269_p1, %p2265_p12 }
 0x3cc   : > { %2273 = shalt.err (!%p2270_p2)
}
 0x3cd   : > { %2102 = dma.vmem_to_hbm [thread:$0]  (%p2492_p4), %s1857_s16, 64, %s1859_s3, %s1825_s7   ;;  %1783 = vrot.lane.b32.xlu1 %v3162_v2, %s3350_s30  ;;  %1785 = vrot.lane.b32.xlu2 %v3180_v34, %s3350_s30 }
 0x3ce   : > { %1781 = vrot.lane.b32.xlu0 %v3159_v63, %s3350_s30  ;;  %s2084_s1 = sshll.u32 %s2514_s17, 6  ;;  %s3353_s18 = sld [smem:[#allocation29_spill]] }
 0x3d4   : > { %s3222_s25 = scalar_lea.vmem %s3353_s18, %s2084_s1 }
 0x3ef   : > { %v1740_v4 = vpop.permute.xlu2 %1739 }
 0x3f7   : > { %v1746_v1 = vpop.permute.xlu2 %1745 }
 0x3ff   : > { %v1774_v43 = vpop.permute.xlu2 %1773 }
 0x407   : > { %v1772_v7 = vpop.permute.xlu1 %1771  ;;  %v1780_v23 = vpop.permute.xlu2 %1779 }
 0x408   : > { %v1708_v18 = vpop.permute.xlu0 %1707 }
 0x409   : > { %v1731_v50 = vmax.f32 %v3094_v17, %v1708_v18 }
 0x40b   : > { %v1763_v44 = vmax.f32 %v1731_v50, %v1740_v4 }
 0x40d   : > { %v1795_v58 = vmax.f32 %v1763_v44, %v1772_v7 }
 0x40f   : > { %1803 = vst.msk [vmem:[%s3222_s25] sm:$0xff] %vm1000_vm0, %v1795_v58  ;;  %v1778_v8 = vpop.permute.xlu1 %1777  ;;  %v1712_v28 = vpop.permute.xlu2 %1711 }
 0x410   : > { %v1714_v12 = vpop.permute.xlu0 %1713  ;;  %v1733_v55 = vmax.f32 %v3144_v54, %v1712_v28 }
 0x411   : > { %v1734_v13 = vmax.f32 %v3106_v19, %v1714_v12 }
 0x413   : > { %v1766_v15 = vmax.f32 %v1734_v13, %v1746_v1 }
 0x415   : > { %v1798_v17 = vmax.f32 %v1766_v15, %v1778_v8 }
 0x417   : > { %1806 = vst.msk [vmem:[%s3222_s25 + $0x18] sm:$0xff] %vm1000_vm0, %v1798_v17  ;;  %v1710_v11 = vpop.permute.xlu1 %1709  ;;  %v1718_v40 = vpop.permute.xlu2 %1717 }
 0x418   : > { %v1732_v62 = vmax.f32 %v3118_v37, %v1710_v11  ;;  %v1742_v16 = vpop.permute.xlu0 %1741  ;;  %v1736_v21 = vmax.f32 %v3159_v63, %v1718_v40 }
 0x41a   : > { %v1764_v27 = vmax.f32 %v1732_v62, %v1742_v16 }
 0x41c   : > { %v1796_v29 = vmax.f32 %v1764_v27, %v1774_v43 }
 0x41e   : > { %1804 = vst.msk [vmem:[%s3222_s25 + $0x8] sm:$0xff] %vm1000_vm0, %v1796_v29 }
 0x41f   : > { %v1716_v52 = vpop.permute.xlu1 %1715  ;;  %v1752_v46 = vpop.permute.xlu2 %1751 }
 0x420   : > { %v1735_v32 = vmax.f32 %v3128_v51, %v1716_v52  ;;  %v1748_v19 = vpop.permute.xlu0 %1747 }
 0x422   : > { %v1767_v33 = vmax.f32 %v1735_v32, %v1748_v19 }
 0x424   : > { %v1799_v3 = vmax.f32 %v1767_v33, %v1780_v23 }
 0x426   : > { %1807 = vst.msk [vmem:[%s3222_s25 + $0x20] sm:$0xff] %vm1000_vm0, %v1799_v3 }
 0x427   : > { %v1744_v14 = vpop.permute.xlu1 %1743  ;;  %v1786_v56 = vpop.permute.xlu2 %1785 }
 0x428   : > { %v1765_v36 = vmax.f32 %v1733_v55, %v1744_v14  ;;  %v1776_v37 = vpop.permute.xlu0 %1775 }
 0x42a   : > { %v1797_v41 = vmax.f32 %v1765_v36, %v1776_v37 }
 0x42c   : > { %1805 = vst.msk [vmem:[%s3222_s25 + $0x10] sm:$0xff] %vm1000_vm0, %v1797_v41 }
 0x42f   : > { %v1750_v26 = vpop.permute.xlu1 %1749 }
 0x430   : > { %v1720_v42 = vpop.permute.xlu0 %1719  ;;  %v1768_v30 = vmax.f32 %v1736_v21, %v1750_v26 }
 0x431   : > { %v1737_v51 = vmax.f32 %v3162_v2, %v1720_v42 }
 0x433   : > { %v1769_v31 = vmax.f32 %v1737_v51, %v1752_v46 }
 0x437   : > { %v1722_v47 = vpop.permute.xlu1 %1721 }
 0x438   : > { %v1738_v10 = vmax.f32 %v3180_v34, %v1722_v47  ;;  %v1754_v49 = vpop.permute.xlu0 %1753 }
 0x43a   : > { %v1770_v0 = vmax.f32 %v1738_v10, %v1754_v49 }
 0x43c   : > { %v1802_v45 = vmax.f32 %v1770_v0, %v1786_v56 }
 0x43e   : > { %1810 = vst.msk [vmem:[%s3222_s25 + $0x38] sm:$0xf] %vm1169_vm11, %v1802_v45 }
 0x43f   : > { %v1784_v39 = vpop.permute.xlu1 %1783 }
 0x440   : > { %v1801_v48 = vmax.f32 %v1769_v31, %v1784_v39  ;;  %v1782_v53 = vpop.permute.xlu0 %1781 }
 0x441   : > { %v1800_v54 = vmax.f32 %v1768_v30, %v1782_v53 }
 0x442   : > { %1809 = vst.msk [vmem:[%s3222_s25 + $0x30] sm:$0xff] %vm1000_vm0, %v1801_v48 }
 0x443   : > { %1808 = vst.msk [vmem:[%s3222_s25 + $0x28] sm:$0xff] %vm1000_vm0, %v1800_v54 }
 0x444 PF: > { %s3354_s17 = sld [smem:[#allocation15_spill]] }
 0x445   : > { %s3355_s30 = sld [smem:[#allocation12_spill]] }
 0x44a   : > { %p2118_p4 = scmp.ge.s32.totalorder %s3354_s17, 2 }
 0x44b   : > { %s1881_s0 = sand.u32 1, %s3355_s30  }
 0x44c   : > { %p2110_p3 = pnand %p2118_p4, %p2499_p8  ;;  %s1882_s2 = scalar_lea.sflag [#allocation4], %s1881_s0 }
 0x44e   : > { %p2111_p5 = pneg %p2110_p3 }
 0x450   : > { %2303 = dma.done.wait (%p2111_p5), %s1882_s2, 64  }
 0x451   : > { %2305 = vsyncadd (%p2111_p5), %s1882_s2, 4294967232  ;;  %s1892_s23 = scalar_lea.sflag [#allocation8], %s1881_s0 }
 0x452   : > { %2307 = dma.done.wait (%p2111_p5), %s1892_s23, 64  }
 0x453   : > { %2309 = vsyncadd (%p2111_p5), %s1892_s23, 4294967232  ;;  %s39_s26 = sadd.s32 1, %s3354_s17   ;;  %s3357_s16 = sld [smem:[#allocation13_spill]] }
 0x454   : > { %p36_p6 = scmp.ge.s32.totalorder %s39_s26, 4   ;;  %s3358_s2 = sld [smem:[#allocation18_spill]] }
 0x455   : > { %s3359_s25 = sld [smem:[#allocation14_spill]]  ;;  %s3361_s23 = smov %s2316_s24 }
 0x456   : > { %s3360_s3 = sld [smem:[#allocation16_spill]]  ;;  %38 = sbr.rel (!%p36_p6) target bundleno = 20 (0x14), region = 167 }
 0x459   : > { %s3362_s24 = smov %s3357_s16 }
 0x45b   :  { %1898 = vsyncpa [#allocation4], 1 }
 0x45c   :  { %1900 = vsyncpa [#allocation4 + $0x1], 1 }
 0x45d   :  { %1901 = vsyncpa [#allocation8], 1 }
 0x45e   :  { %1903 = vsyncpa [#allocation8 + $0x1], 1 }
 0x45f   :  { %1904 = vsyncpa [#allocation5], 1 }
 0x460   :  { %1906 = vsyncpa [#allocation5 + $0x1], 1 }

</bundles_post_ra>
